<compile_context>
chip_gen: v5e
topology: v5e:2x2
jax: 0.10.0
libtpu: 0.0.40
codegen_flags: <defaults>
</compile_context>

<pallas_src>
import functools

import jax
import jax.numpy as jnp
from jax.experimental import pallas as pl
from jax.experimental.pallas import tpu as pltpu


def _round_up(x, m):
    return ((x + m - 1) // m) * m


def _tile_forward(p16, q16, r16, w1_ref, b1_ref, w2_ref, b2_ref,
                  out_ref, norm_ref, *, emb_dim, norm_mask=None):
    """Shared per-tile MLP + norm-partial computation.

    p16/q16/r16: (TB, E) bf16 embeddings for this tile.
    out_ref:     (1, TB) f32 lane-dense inferences block.
    norm_ref:    (8, 128) f32 block; rows 0/1/2 carry this tile's sum(p^2)/sum(q^2)/sum(r^2).
    """
    E = emb_dim
    f32 = jnp.float32

    # Hidden layer: three K=E bf16 MXU pushes against static row slabs of W1
    # (no lane-wise concat), f32 accumulation.
    h = jnp.dot(p16, w1_ref[0:E, :], preferred_element_type=f32)
    h = h + jnp.dot(q16, w1_ref[E:2 * E, :], preferred_element_type=f32)
    h = h + jnp.dot(r16, w1_ref[2 * E:3 * E, :], preferred_element_type=f32)
    h = jax.nn.sigmoid(h + b1_ref[...])                        # (TB, 3E) f32

    # Output layer (3E -> 1) as f32 VPU multiply + lane reduction (an N=1 MXU matmul
    # would pad the output lanes and waste the systolic array).
    y = jnp.sum(h * w2_ref[...], axis=-1)                      # (TB,)
    out_ref[...] = (y[None, :] + b2_ref[...]).astype(out_ref.dtype)   # (1, TB) lane-dense

    # Per-tile partial sum-of-squares (f32), written to rows 0/1/2 of the norm block.
    p32 = p16.astype(f32)
    q32 = q16.astype(f32)
    r32 = r16.astype(f32)
    if norm_mask is not None:                                   # mask padded tail rows
        p32 = p32 * norm_mask
        q32 = q32 * norm_mask
        r32 = r32 * norm_mask
    pp = jnp.sum(p32 * p32)
    qq = jnp.sum(q32 * q32)
    rr = jnp.sum(r32 * r32)
    rid = jax.lax.broadcasted_iota(jnp.int32, (8, 128), 0)
    norm_ref[...] = jnp.where(rid == 0, pp,
                    jnp.where(rid == 1, qq,
                    jnp.where(rid == 2, rr, jnp.zeros_like(pp))))


def _fused_kernel(pidx_ref, qidx_ref, ridx_ref,
                  ptbl_ref, qtbl_ref, rtbl_ref,
                  w1_ref, b1_ref, w2_ref, b2_ref,
                  out_ref, norm_ref, *, emb_dim):
    """Fused embedding gather (one-hot bf16 MXU matmul vs VMEM-resident tables) + MLP."""

    def gather16(idx_ref, tbl_ref):
        tb = idx_ref.shape[0]
        nrow = tbl_ref.shape[0]
        idx = idx_ref[...]                                           # (TB, 1) int32
        iota = jax.lax.broadcasted_iota(jnp.int32, (tb, nrow), 1)
        onehot = (idx == iota).astype(tbl_ref.dtype)                 # (TB, nrow) bf16
        # Padded (sentinel) indices match no iota value -> all-zero row -> zero embedding.
        e = jnp.dot(onehot, tbl_ref[...], preferred_element_type=jnp.float32)
        return e.astype(jnp.bfloat16)                                # exact: table is bf16

    p16 = gather16(pidx_ref, ptbl_ref)
    q16 = gather16(qidx_ref, qtbl_ref)
    r16 = gather16(ridx_ref, rtbl_ref)
    _tile_forward(p16, q16, r16, w1_ref, b1_ref, w2_ref, b2_ref,
                  out_ref, norm_ref, emb_dim=emb_dim)


def _unfused_kernel(p_ref, q_ref, r_ref,
                    w1_ref, b1_ref, w2_ref, b2_ref,
                    out_ref, norm_ref, *, emb_dim, tile_b, n_valid, mask_tail):
    """Pre-gathered bf16 embedding tiles; tail rows masked out of the norm only."""
    mask = None
    if mask_tail:
        row = (pl.program_id(0) * tile_b
               + jax.lax.broadcasted_iota(jnp.int32, (tile_b, 1), 0))
        mask = (row < n_valid).astype(jnp.float32)                   # (TB, 1)
    _tile_forward(p_ref[...], q_ref[...], r_ref[...],
                  w1_ref, b1_ref, w2_ref, b2_ref,
                  out_ref, norm_ref, emb_dim=emb_dim, norm_mask=mask)


def auto_neural_triple_forward(ps, qs, rs, params, reg, *, fuse_gather=None):
    """AutoNeural_Triple forward. Returns (inferences (B, 1) f32, regs scalar f32)."""
    P_tbl, Q_tbl, R_tbl = params["P_emb"], params["Q_emb"], params["R_emb"]
    B = int(ps.shape[0])
    E = int(P_tbl.shape[1])
    H = 3 * E

    # Lane-dense batch tile: multiple of 128, up to 1024 rows per grid step.
    TB = min(1024, _round_up(max(B, 1), 128))
    B_pad = _round_up(B, TB)
    G = B_pad // TB

    # MXU/DMA operands in bf16; VPU-side operands (b1, W2 row, b2) stay f32.
    w1 = params["W1"].astype(jnp.bfloat16)                       # (3E, 3E), (in, out)
    b1 = params["b1"].reshape(1, H).astype(jnp.float32)          # (1, 3E)
    w2 = params["W2"].reshape(1, H).astype(jnp.float32)          # (3E, 1) -> (1, 3E)
    b2 = params["b2"].reshape(1, 1).astype(jnp.float32)          # (1, 1)

    # Padded table row counts for the fused one-hot gather.
    np_pad = _round_up(int(P_tbl.shape[0]), 128)
    nq_pad = _round_up(int(Q_tbl.shape[0]), 128)
    nr_pad = _round_up(int(R_tbl.shape[0]), 128)
    tbl_bytes = (np_pad + nq_pad + nr_pad) * E * 2
    if fuse_gather is None:
        # Fuse only while the resident tables (and the (TB, n_rows) one-hot tiles)
        # stay comfortably small; otherwise fall back to the XLA gather.
        # TODO(synk): a paged / manual-DMA gather would cover large tables too.
        fuse_gather = (max(np_pad, nq_pad, nr_pad) <= 1024) and (tbl_bytes <= 2 * 2**20)

    common_w_specs = [
        pl.BlockSpec((H, H), lambda i: (0, 0)),      # W1 (resident across steps)
        pl.BlockSpec((1, H), lambda i: (0, 0)),      # b1
        pl.BlockSpec((1, H), lambda i: (0, 0)),      # W2 as row
        pl.BlockSpec((1, 1), lambda i: (0, 0)),      # b2
    ]
    out_specs = [
        pl.BlockSpec((1, TB), lambda i: (0, i)),     # inferences, lane-dense
        pl.BlockSpec((8, 128), lambda i: (0, i)),    # per-tile norm partials
    ]
    out_shape = (jax.ShapeDtypeStruct((1, B_pad), jnp.float32),
                 jax.ShapeDtypeStruct((8, 128 * G), jnp.float32))

    if fuse_gather:
        def pad_idx(idx, sentinel):
            idx = idx.astype(jnp.int32).reshape(B, 1)
            if B_pad != B:
                # Sentinel is out of the padded-table range -> all-zero one-hot row.
                idx = jnp.pad(idx, ((0, B_pad - B), (0, 0)), constant_values=sentinel)
            return idx

        def pad_tbl(tbl, n_pad):
            tbl = tbl.astype(jnp.bfloat16)
            return jnp.pad(tbl, ((0, n_pad - tbl.shape[0]), (0, 0)))

        args = (pad_idx(ps, np_pad), pad_idx(qs, nq_pad), pad_idx(rs, nr_pad),
                pad_tbl(P_tbl, np_pad), pad_tbl(Q_tbl, nq_pad), pad_tbl(R_tbl, nr_pad),
                w1, b1, w2, b2)
        in_specs = [
            pl.BlockSpec((TB, 1), lambda i: (i, 0)),          # p indices
            pl.BlockSpec((TB, 1), lambda i: (i, 0)),          # q indices
            pl.BlockSpec((TB, 1), lambda i: (i, 0)),          # r indices
            pl.BlockSpec((np_pad, E), lambda i: (0, 0)),      # P table (resident)
            pl.BlockSpec((nq_pad, E), lambda i: (0, 0)),      # Q table (resident)
            pl.BlockSpec((nr_pad, E), lambda i: (0, 0)),      # R table (resident)
        ] + common_w_specs
        kernel = functools.partial(_fused_kernel, emb_dim=E)
        in_block_bytes = 3 * TB * 4 + tbl_bytes + H * H * 2 + 2 * H * 4 + 4
        intermediate_bytes = 3 * TB * max(np_pad, nq_pad, nr_pad) * 2 + 4 * TB * H * 4
    else:
        def pad_gather(tbl, idx):
            idx = idx.astype(jnp.int32)
            if B_pad != B:
                # Pads with the (valid) index 0; those rows are masked in-kernel for
                # the norm and their inferences are sliced off below.
                idx = jnp.pad(idx, (0, B_pad - B))
            return tbl.astype(jnp.bfloat16)[idx]              # (B_pad, E) bf16 gather

        args = (pad_gather(P_tbl, ps), pad_gather(Q_tbl, qs), pad_gather(R_tbl, rs),
                w1, b1, w2, b2)
        in_specs = [pl.BlockSpec((TB, E), lambda i: (i, 0))] * 3 + common_w_specs
        kernel = functools.partial(_unfused_kernel, emb_dim=E, tile_b=TB,
                                   n_valid=B, mask_tail=(B_pad != B))
        in_block_bytes = 3 * TB * E * 2 + H * H * 2 + 2 * H * 4 + 4
        intermediate_bytes = 4 * TB * H * 4 + 3 * TB * E * 4

    # Rough double-buffered VMEM footprint; only raise the scoped limit when needed
    # (cap at v7x's 64 MiB physical VMEM).
    out_block_bytes = TB * 4 + 8 * 128 * 4
    est = 2 * (in_block_bytes + out_block_bytes) + intermediate_bytes
    cp_kwargs = dict(dimension_semantics=("parallel",))
    if est > 12 * 2**20:
        cp_kwargs["vmem_limit_bytes"] = int(min(2 * est, 64 * 2**20))

    grid_spec = pltpu.PrefetchScalarGridSpec(
        num_scalar_prefetch=0,
        grid=(G,),
        in_specs=in_specs,
        out_specs=out_specs,
    )

    out_row, norm_parts = pl.pallas_call(
        kernel,
        out_shape=out_shape,
        grid_spec=grid_spec,
        compiler_params=pltpu.CompilerParams(**cp_kwargs),
    )(*args)

    inferences = out_row[0, :B].reshape(B, 1)
    # Per-tile scalar partials live in lane 0 of each 128-lane block, rows 0/1/2.
    lane0 = norm_parts[:, ::128]                                  # (8, G)
    regs = reg * (jnp.sqrt(jnp.sum(lane0[0]))
                  + jnp.sqrt(jnp.sum(lane0[1]))
                  + jnp.sqrt(jnp.sum(lane0[2])))
    return inferences, regs


def init_params(key, num_ps, num_qs, num_rs, embedding_dim):
    """Deterministic parameter init matching the module's shapes."""
    H = 3 * embedding_dim
    k = jax.random.split(key, 7)
    return {
        "P_emb": jax.random.normal(k[0], (num_ps, embedding_dim), jnp.float32),
        "Q_emb": jax.random.normal(k[1], (num_qs, embedding_dim), jnp.float32),
        "R_emb": jax.random.normal(k[2], (num_rs, embedding_dim), jnp.float32),
        # Stored as (in, out) == torch weight (out, in) transposed.
        "W1": jax.random.normal(k[3], (H, H), jnp.float32) * (1.0 / jnp.sqrt(H)),
        "b1": jax.random.normal(k[4], (H,), jnp.float32) * 0.01,
        "W2": jax.random.normal(k[5], (H, 1), jnp.float32) * (1.0 / jnp.sqrt(H)),
        "b2": jax.random.normal(k[6], (1,), jnp.float32) * 0.01,
    }


if __name__ == "__main__":
    num_ps, num_qs, num_rs = 10, 12, 14
    embedding_dim = 32
    reg = 0.01
    B = 8

    key = jax.random.PRNGKey(0)
    pkey, ikey = jax.random.split(key)
    params = init_params(pkey, num_ps, num_qs, num_rs, embedding_dim)

    kp, kq, kr = jax.random.split(ikey, 3)
    ps = jax.random.randint(kp, (B,), 0, num_ps, dtype=jnp.int32)
    qs = jax.random.randint(kq, (B,), 0, num_qs, dtype=jnp.int32)
    rs = jax.random.randint(kr, (B,), 0, num_rs, dtype=jnp.int32)

    # Run both the fused-gather path (tables VMEM-resident) and the XLA-gather fallback.
    inf_fused, regs_fused = auto_neural_triple_forward(ps, qs, rs, params, reg)
    inf_plain, regs_plain = auto_neural_triple_forward(ps, qs, rs, params, reg,
                                                       fuse_gather=False)
    jax.block_until_ready((inf_fused, regs_fused, inf_plain, regs_plain))

    # Pure-JAX f32 reference (original module math, no Pallas).
    p_e = params["P_emb"][ps]
    q_e = params["Q_emb"][qs]
    r_e = params["R_emb"][rs]
    x = jnp.concatenate([p_e, q_e, r_e], axis=-1)
    h = jax.nn.sigmoid(x @ params["W1"] + params["b1"][None, :])
    ref_out = h @ params["W2"] + params["b2"][None, :]
    ref_regs = reg * (jnp.linalg.norm(p_e) + jnp.linalg.norm(q_e) + jnp.linalg.norm(r_e))

    for inf, rg in ((inf_fused, regs_fused), (inf_plain, regs_plain)):
        assert inf.shape == (B, 1)
        # bf16 storage on the DMA/MXU path -> loosened tolerance (accumulation is f32).
        assert jnp.allclose(inf, ref_out, atol=2e-2, rtol=2e-2)
        assert jnp.allclose(rg, ref_regs, atol=1e-3, rtol=1e-2)

    print("KERNEL_OK")
</pallas_src>

<mosaic_0001>
module attributes {stable_mosaic.version = 11 : i64} {
  func.func @_fused_kernel(%arg0: i32, %arg1: memref<128x1xi32, #tpu.memory_space<vmem>>, %arg2: memref<128x1xi32, #tpu.memory_space<vmem>>, %arg3: memref<128x1xi32, #tpu.memory_space<vmem>>, %arg4: memref<128x32xbf16, #tpu.memory_space<vmem>>, %arg5: memref<128x32xbf16, #tpu.memory_space<vmem>>, %arg6: memref<128x32xbf16, #tpu.memory_space<vmem>>, %arg7: memref<96x96xbf16, #tpu.memory_space<vmem>>, %arg8: memref<1x96xf32, #tpu.memory_space<vmem>>, %arg9: memref<1x96xf32, #tpu.memory_space<vmem>>, %arg10: memref<1x1xf32, #tpu.memory_space<vmem>>, %arg11: memref<1x128xf32, #tpu.memory_space<vmem>>, %arg12: memref<8x128xf32, #tpu.memory_space<vmem>>) attributes {dimension_semantics = [#tpu.dimension_semantics<parallel>], iteration_bounds = array<i64: 1>, scalar_prefetch = 0 : i64, scratch_operands = 0 : i64, tpu.core_type = #tpu.core_type<tc>, window_params = [{transform_indices = @transform_0, window_bounds = array<i64: 128, 1>}, {transform_indices = @transform_1, window_bounds = array<i64: 128, 1>}, {transform_indices = @transform_2, window_bounds = array<i64: 128, 1>}, {pipeline_mode = #tpu.pipeline_mode<synchronous>, transform_indices = @transform_3, window_bounds = array<i64: 128, 32>}, {pipeline_mode = #tpu.pipeline_mode<synchronous>, transform_indices = @transform_4, window_bounds = array<i64: 128, 32>}, {pipeline_mode = #tpu.pipeline_mode<synchronous>, transform_indices = @transform_5, window_bounds = array<i64: 128, 32>}, {pipeline_mode = #tpu.pipeline_mode<synchronous>, transform_indices = @transform_6, window_bounds = array<i64: 96, 96>}, {pipeline_mode = #tpu.pipeline_mode<synchronous>, transform_indices = @transform_7, window_bounds = array<i64: 1, 96>}, {pipeline_mode = #tpu.pipeline_mode<synchronous>, transform_indices = @transform_8, window_bounds = array<i64: 1, 96>}, {pipeline_mode = #tpu.pipeline_mode<synchronous>, transform_indices = @transform_9, window_bounds = array<i64: 1, 1>}, {transform_indices = @transform_10, window_bounds = array<i64: 1, 128>}, {transform_indices = @transform_11, window_bounds = array<i64: 8, 128>}]} {
    %c0 = arith.constant 0 : index
    %c0_0 = arith.constant 0 : index
    %0 = vector.load %arg1[%c0, %c0_0] : memref<128x1xi32, #tpu.memory_space<vmem>>, vector<128x1xi32>
    %1 = tpu.iota {dimensions = array<i32: 1>} : vector<128x128xi32>
    %2 = vector.broadcast %0 : vector<128x1xi32> to vector<128x128xi32>
    %3 = arith.cmpi eq, %2, %1 : vector<128x128xi32>
    %4 = arith.extui %3 : vector<128x128xi1> to vector<128x128xi32>
    %5 = arith.sitofp %4 : vector<128x128xi32> to vector<128x128xf32>
    %6 = arith.truncf %5 : vector<128x128xf32> to vector<128x128xbf16>
    %c0_1 = arith.constant 0 : index
    %c0_2 = arith.constant 0 : index
    %7 = vector.load %arg4[%c0_1, %c0_2] : memref<128x32xbf16, #tpu.memory_space<vmem>>, vector<128x32xbf16>
    %cst = arith.constant dense<0.000000e+00> : vector<128x32xf32>
    %8 = tpu.matmul %6, %7, %cst {dimension_numbers = #tpu.dot_dimension_numbers<[1], [0], [0], [1], [0, 0, 1, 1], [], []>} : vector<128x128xbf16>, vector<128x32xbf16>, vector<128x32xf32> -> vector<128x32xf32>
    %9 = arith.truncf %8 : vector<128x32xf32> to vector<128x32xbf16>
    %c0_3 = arith.constant 0 : index
    %c0_4 = arith.constant 0 : index
    %10 = vector.load %arg2[%c0_3, %c0_4] : memref<128x1xi32, #tpu.memory_space<vmem>>, vector<128x1xi32>
    %11 = tpu.iota {dimensions = array<i32: 1>} : vector<128x128xi32>
    %12 = vector.broadcast %10 : vector<128x1xi32> to vector<128x128xi32>
    %13 = arith.cmpi eq, %12, %11 : vector<128x128xi32>
    %14 = arith.extui %13 : vector<128x128xi1> to vector<128x128xi32>
    %15 = arith.sitofp %14 : vector<128x128xi32> to vector<128x128xf32>
    %16 = arith.truncf %15 : vector<128x128xf32> to vector<128x128xbf16>
    %c0_5 = arith.constant 0 : index
    %c0_6 = arith.constant 0 : index
    %17 = vector.load %arg5[%c0_5, %c0_6] : memref<128x32xbf16, #tpu.memory_space<vmem>>, vector<128x32xbf16>
    %cst_7 = arith.constant dense<0.000000e+00> : vector<128x32xf32>
    %18 = tpu.matmul %16, %17, %cst_7 {dimension_numbers = #tpu.dot_dimension_numbers<[1], [0], [0], [1], [0, 0, 1, 1], [], []>} : vector<128x128xbf16>, vector<128x32xbf16>, vector<128x32xf32> -> vector<128x32xf32>
    %19 = arith.truncf %18 : vector<128x32xf32> to vector<128x32xbf16>
    %c0_8 = arith.constant 0 : index
    %c0_9 = arith.constant 0 : index
    %20 = vector.load %arg3[%c0_8, %c0_9] : memref<128x1xi32, #tpu.memory_space<vmem>>, vector<128x1xi32>
    %21 = tpu.iota {dimensions = array<i32: 1>} : vector<128x128xi32>
    %22 = vector.broadcast %20 : vector<128x1xi32> to vector<128x128xi32>
    %23 = arith.cmpi eq, %22, %21 : vector<128x128xi32>
    %24 = arith.extui %23 : vector<128x128xi1> to vector<128x128xi32>
    %25 = arith.sitofp %24 : vector<128x128xi32> to vector<128x128xf32>
    %26 = arith.truncf %25 : vector<128x128xf32> to vector<128x128xbf16>
    %c0_10 = arith.constant 0 : index
    %c0_11 = arith.constant 0 : index
    %27 = vector.load %arg6[%c0_10, %c0_11] : memref<128x32xbf16, #tpu.memory_space<vmem>>, vector<128x32xbf16>
    %cst_12 = arith.constant dense<0.000000e+00> : vector<128x32xf32>
    %28 = tpu.matmul %26, %27, %cst_12 {dimension_numbers = #tpu.dot_dimension_numbers<[1], [0], [0], [1], [0, 0, 1, 1], [], []>} : vector<128x128xbf16>, vector<128x32xbf16>, vector<128x32xf32> -> vector<128x32xf32>
    %29 = arith.truncf %28 : vector<128x32xf32> to vector<128x32xbf16>
    %c0_13 = arith.constant 0 : index
    %c0_14 = arith.constant 0 : index
    %30 = vector.load %arg7[%c0_13, %c0_14] : memref<96x96xbf16, #tpu.memory_space<vmem>>, vector<32x96xbf16>
    %cst_15 = arith.constant dense<0.000000e+00> : vector<128x96xf32>
    %31 = tpu.matmul %9, %30, %cst_15 {dimension_numbers = #tpu.dot_dimension_numbers<[1], [0], [0], [1], [0, 0, 1, 1], [], []>} : vector<128x32xbf16>, vector<32x96xbf16>, vector<128x96xf32> -> vector<128x96xf32>
    %c32 = arith.constant 32 : index
    %c0_16 = arith.constant 0 : index
    %32 = vector.load %arg7[%c32, %c0_16] : memref<96x96xbf16, #tpu.memory_space<vmem>>, vector<32x96xbf16>
    %cst_17 = arith.constant dense<0.000000e+00> : vector<128x96xf32>
    %33 = tpu.matmul %19, %32, %cst_17 {dimension_numbers = #tpu.dot_dimension_numbers<[1], [0], [0], [1], [0, 0, 1, 1], [], []>} : vector<128x32xbf16>, vector<32x96xbf16>, vector<128x96xf32> -> vector<128x96xf32>
    %34 = arith.addf %31, %33 : vector<128x96xf32>
    %c64 = arith.constant 64 : index
    %c0_18 = arith.constant 0 : index
    %35 = vector.load %arg7[%c64, %c0_18] : memref<96x96xbf16, #tpu.memory_space<vmem>>, vector<32x96xbf16>
    %cst_19 = arith.constant dense<0.000000e+00> : vector<128x96xf32>
    %36 = tpu.matmul %29, %35, %cst_19 {dimension_numbers = #tpu.dot_dimension_numbers<[1], [0], [0], [1], [0, 0, 1, 1], [], []>} : vector<128x32xbf16>, vector<32x96xbf16>, vector<128x96xf32> -> vector<128x96xf32>
    %37 = arith.addf %34, %36 : vector<128x96xf32>
    %c0_20 = arith.constant 0 : index
    %c0_21 = arith.constant 0 : index
    %38 = vector.load %arg8[%c0_20, %c0_21] : memref<1x96xf32, #tpu.memory_space<vmem>>, vector<1x96xf32>
    %39 = vector.broadcast %38 : vector<1x96xf32> to vector<128x96xf32>
    %40 = arith.addf %37, %39 : vector<128x96xf32>
    %41 = arith.negf %40 : vector<128x96xf32>
    %42 = math.exp %41 : vector<128x96xf32>
    %cst_22 = arith.constant 1.000000e+00 : f32
    %43 = vector.broadcast %cst_22 : f32 to vector<128x96xf32>
    %44 = arith.addf %43, %42 : vector<128x96xf32>
    %45 = arith.divf %43, %44 : vector<128x96xf32>
    %c0_23 = arith.constant 0 : index
    %c0_24 = arith.constant 0 : index
    %46 = vector.load %arg9[%c0_23, %c0_24] : memref<1x96xf32, #tpu.memory_space<vmem>>, vector<1x96xf32>
    %47 = vector.broadcast %46 : vector<1x96xf32> to vector<128x96xf32>
    %48 = arith.mulf %45, %47 : vector<128x96xf32>
    %cst_25 = arith.constant dense<0.000000e+00> : vector<128xf32>
    %49 = vector.multi_reduction <add>, %48, %cst_25 [1] : vector<128x96xf32> to vector<128xf32>
    %50 = vector.shape_cast %49 : vector<128xf32> to vector<1x128xf32>
    %c0_26 = arith.constant 0 : index
    %c0_27 = arith.constant 0 : index
    %51 = vector.load %arg10[%c0_26, %c0_27] : memref<1x1xf32, #tpu.memory_space<vmem>>, vector<1x1xf32>
    %52 = vector.broadcast %51 : vector<1x1xf32> to vector<1x128xf32>
    %53 = arith.addf %50, %52 : vector<1x128xf32>
    %c0_28 = arith.constant 0 : index
    %c0_29 = arith.constant 0 : index
    %54 = vector.load %arg11[%c0_28, %c0_29] : memref<1x128xf32, #tpu.memory_space<vmem>>, vector<1x128xf32>
    tpu.vector_store %arg11[%c0_28, %c0_29], %53 {strides = array<i32>} : memref<1x128xf32, #tpu.memory_space<vmem>>, vector<1x128xf32>,
    %55 = arith.extf %9 : vector<128x32xbf16> to vector<128x32xf32>
    %56 = arith.extf %19 : vector<128x32xbf16> to vector<128x32xf32>
    %57 = arith.extf %29 : vector<128x32xbf16> to vector<128x32xf32>
    %58 = arith.mulf %55, %55 : vector<128x32xf32>
    %59 = vector.shape_cast %58 : vector<128x32xf32> to vector<1x128x32xf32>
    %cst_30 = arith.constant dense<0.000000e+00> : vector<1xf32>
    %60 = vector.multi_reduction <add>, %59, %cst_30 [1, 2] : vector<1x128x32xf32> to vector<1xf32>
    %61 = vector.shape_cast %60 : vector<1xf32> to vector<1x1x1xf32>
    %62 = vector.extract %61[0, 0, 0] : f32 from vector<1x1x1xf32>
    %63 = arith.mulf %56, %56 : vector<128x32xf32>
    %64 = vector.shape_cast %63 : vector<128x32xf32> to vector<1x128x32xf32>
    %cst_31 = arith.constant dense<0.000000e+00> : vector<1xf32>
    %65 = vector.multi_reduction <add>, %64, %cst_31 [1, 2] : vector<1x128x32xf32> to vector<1xf32>
    %66 = vector.shape_cast %65 : vector<1xf32> to vector<1x1x1xf32>
    %67 = vector.extract %66[0, 0, 0] : f32 from vector<1x1x1xf32>
    %68 = arith.mulf %57, %57 : vector<128x32xf32>
    %69 = vector.shape_cast %68 : vector<128x32xf32> to vector<1x128x32xf32>
    %cst_32 = arith.constant dense<0.000000e+00> : vector<1xf32>
    %70 = vector.multi_reduction <add>, %69, %cst_32 [1, 2] : vector<1x128x32xf32> to vector<1xf32>
    %71 = vector.shape_cast %70 : vector<1xf32> to vector<1x1x1xf32>
    %72 = vector.extract %71[0, 0, 0] : f32 from vector<1x1x1xf32>
    %73 = tpu.iota {dimensions = array<i32: 0>} : vector<8x128xi32>
    %c0_i32 = arith.constant 0 : i32
    %74 = vector.broadcast %c0_i32 : i32 to vector<8x128xi32>
    %75 = arith.cmpi eq, %73, %74 : vector<8x128xi32>
    %c1_i32 = arith.constant 1 : i32
    %76 = vector.broadcast %c1_i32 : i32 to vector<8x128xi32>
    %77 = arith.cmpi eq, %73, %76 : vector<8x128xi32>
    %c2_i32 = arith.constant 2 : i32
    %78 = vector.broadcast %c2_i32 : i32 to vector<8x128xi32>
    %79 = arith.cmpi eq, %73, %78 : vector<8x128xi32>
    %cst_33 = arith.constant 0.000000e+00 : f32
    %80 = vector.broadcast %72 : f32 to vector<8x128xf32>
    %81 = vector.broadcast %cst_33 : f32 to vector<8x128xf32>
    %82 = arith.select %79, %80, %81 : vector<8x128xi1>, vector<8x128xf32>
    %83 = vector.broadcast %67 : f32 to vector<8x128xf32>
    %84 = arith.select %77, %83, %82 : vector<8x128xi1>, vector<8x128xf32>
    %85 = vector.broadcast %62 : f32 to vector<8x128xf32>
    %86 = arith.select %75, %85, %84 : vector<8x128xi1>, vector<8x128xf32>
    %c0_34 = arith.constant 0 : index
    %c0_35 = arith.constant 0 : index
    %87 = vector.load %arg12[%c0_34, %c0_35] : memref<8x128xf32, #tpu.memory_space<vmem>>, vector<8x128xf32>
    tpu.vector_store %arg12[%c0_34, %c0_35], %86 {strides = array<i32>} : memref<8x128xf32, #tpu.memory_space<vmem>>, vector<8x128xf32>,
    return
  }
  func.func @transform_0(%arg0: i32) -> (i32, i32) {
    %c0_i32 = arith.constant 0 : i32
    %c0_i32_0 = arith.constant 0 : i32
    return %arg0, %c0_i32 : i32, i32
  }
  func.func @transform_1(%arg0: i32) -> (i32, i32) {
    %c0_i32 = arith.constant 0 : i32
    %c0_i32_0 = arith.constant 0 : i32
    return %arg0, %c0_i32 : i32, i32
  }
  func.func @transform_2(%arg0: i32) -> (i32, i32) {
    %c0_i32 = arith.constant 0 : i32
    %c0_i32_0 = arith.constant 0 : i32
    return %arg0, %c0_i32 : i32, i32
  }
  func.func @transform_3(%arg0: i32) -> (i32, i32) {
    %c0_i32 = arith.constant 0 : i32
    %c0_i32_0 = arith.constant 0 : i32
    %c0_i32_1 = arith.constant 0 : i32
    return %c0_i32, %c0_i32_0 : i32, i32
  }
  func.func @transform_4(%arg0: i32) -> (i32, i32) {
    %c0_i32 = arith.constant 0 : i32
    %c0_i32_0 = arith.constant 0 : i32
    %c0_i32_1 = arith.constant 0 : i32
    return %c0_i32, %c0_i32_0 : i32, i32
  }
  func.func @transform_5(%arg0: i32) -> (i32, i32) {
    %c0_i32 = arith.constant 0 : i32
    %c0_i32_0 = arith.constant 0 : i32
    %c0_i32_1 = arith.constant 0 : i32
    return %c0_i32, %c0_i32_0 : i32, i32
  }
  func.func @transform_6(%arg0: i32) -> (i32, i32) {
    %c0_i32 = arith.constant 0 : i32
    %c0_i32_0 = arith.constant 0 : i32
    %c0_i32_1 = arith.constant 0 : i32
    return %c0_i32, %c0_i32_0 : i32, i32
  }
  func.func @transform_7(%arg0: i32) -> (i32, i32) {
    %c0_i32 = arith.constant 0 : i32
    %c0_i32_0 = arith.constant 0 : i32
    %c0_i32_1 = arith.constant 0 : i32
    return %c0_i32, %c0_i32_0 : i32, i32
  }
  func.func @transform_8(%arg0: i32) -> (i32, i32) {
    %c0_i32 = arith.constant 0 : i32
    %c0_i32_0 = arith.constant 0 : i32
    %c0_i32_1 = arith.constant 0 : i32
    return %c0_i32, %c0_i32_0 : i32, i32
  }
  func.func @transform_9(%arg0: i32) -> (i32, i32) {
    %c0_i32 = arith.constant 0 : i32
    %c0_i32_0 = arith.constant 0 : i32
    %c0_i32_1 = arith.constant 0 : i32
    return %c0_i32, %c0_i32_0 : i32, i32
  }
  func.func @transform_10(%arg0: i32) -> (i32, i32) {
    %c0_i32 = arith.constant 0 : i32
    %c0_i32_0 = arith.constant 0 : i32
    return %c0_i32, %arg0 : i32, i32
  }
  func.func @transform_11(%arg0: i32) -> (i32, i32) {
    %c0_i32 = arith.constant 0 : i32
    %c0_i32_0 = arith.constant 0 : i32
    return %c0_i32, %arg0 : i32, i32
  }
}

</mosaic_0001>

<bundles_post_ra>
// kernel: tpu_custom_call.1
= control target key start
LH: loop header
LB: loop body
LE: loop exit
PB: predicated region body
PF: predicated region fallthrough
CT: control target
= control target key end

     0   :  { %s3191_s0 = inlined_call_operand.vmem [shape: s32[128,1], index: 0, kind: input, shape index: {}]   ;;  %s3192_s1 = inlined_call_operand.vmem [shape: s32[128,1], index: 1, kind: input, shape index: {}]   ;;  %s3193_s2 = inlined_call_operand.vmem [shape: s32[128,1], index: 2, kind: input, shape index: {}]   ;;  %s3194_s3 = inlined_call_operand.vmem [shape: bf16[128,32], index: 3, kind: input, shape index: {}]   ;;  %s3195_s4 = inlined_call_operand.vmem [shape: bf16[128,32], index: 4, kind: input, shape index: {}]   ;;  %s3196_s5 = inlined_call_operand.vmem [shape: bf16[128,32], index: 5, kind: input, shape index: {}]   ;;  %s3197_s6 = inlined_call_operand.vmem [shape: bf16[96,96], index: 6, kind: input, shape index: {}]   ;;  %s3198_s7 = inlined_call_operand.vmem [shape: f32[1,96], index: 7, kind: input, shape index: {}]   ;;  %s3199_s8 = inlined_call_operand.vmem [shape: f32[1,96], index: 8, kind: input, shape index: {}]   ;;  %s3200_s9 = inlined_call_operand.<no memory space> [shape: f32[1,1], index: 9, kind: input, shape index: {}]   ;;  %s3201_s10 = inlined_call_operand.hbm [shape: f32[1,128], index: 10, kind: output, shape index: {0}]   ;;  %s3202_s11 = inlined_call_operand.hbm [shape: f32[8,128], index: 11, kind: output, shape index: {1}]  }
   0x1   :  { %v17_v0 = vstv %s3200_s9 }
   0x2   :  { %18 = vst [vmem:[#allocation2] sm:$0x1] %v17_v0 }
   0x3   :  { %19 = vsyncpa [#allocation4], 0  ;;  %v54_v1 = vld [vmem:[%s3191_s0 + $0x60] sm:$0xff]  ;;  %v52_v2 = vld [vmem:[%s3191_s0 + $0x50] sm:$0xff]  ;;  %v2377_v4 = vmov 0  }
   0x4   :  { %v50_v3 = vld [vmem:[%s3191_s0 + $0x40] sm:$0xff]  ;;  %2258 = vset.pattern.permute.xlu2 %v2377_v4  ;;  %2257 = vset.pattern.permute.xlu1 %v2377_v4 }
   0x5   :  { %2256 = vset.pattern.permute.xlu0 %v2377_v4  ;;  %97 = vperm.xlu2 %2258, %v54_v1  }
   0x6   :  { %91 = vperm.xlu1 %2257, %v52_v2   ;;  %85 = vperm.xlu0 %2256, %v50_v3  }
   0x7   :  { %20 = vsyncpa [#allocation6], 0  ;;  %v55_v5 = vld [vmem:[%s3191_s0 + $0x68] sm:$0xff]  ;;  %v53_v6 = vld [vmem:[%s3191_s0 + $0x58] sm:$0xff]  ;;  %v58_v62 = vlaneseq  ;;  %s2379_s24 = smov [#allocation5]   ;;  %s1936_s27 = sshll.u32 %s3202_s11, 4  ;;  %s1937_s27 = int_to_ptr.hbm [resolvable:$true] %s1936_s27 }
   0x8   :  { %v51_v7 = vld [vmem:[%s3191_s0 + $0x48] sm:$0xff]  ;;  %v293_v8 = vld [vmem:[%s3192_s1] sm:$0xff]  ;;  %v57_v9 = vld [vmem:[%s3191_s0 + $0x78] sm:$0xff]  ;;  %s1934_s9 = sshll.u32 %s2379_s24, 4  ;;  %s2380_s11 = smov [#allocation3]   ;;  %s1935_s9 = int_to_ptr.vmem [resolvable:$true] %s1934_s9 }
   0x9   :  { %v56_v10 = vld [vmem:[%s3191_s0 + $0x70] sm:$0xff]  ;;  %v296_v11 = vld [vmem:[%s3192_s1 + $0x18] sm:$0xff]  ;;  %v294_v13 = vld [vmem:[%s3192_s1 + $0x8] sm:$0xff]  ;;  %v2631_v4 = vand.u32 127, %v58_v62  ;;  %s1923_s28 = sshll.u32 %s2380_s11, 4  ;;  %s1925_s12 = sshll.u32 %s3201_s10, 4  ;;  %s1924_s28 = int_to_ptr.vmem [resolvable:$true] %s1923_s28  ;;  %s1926_s12 = int_to_ptr.hbm [resolvable:$true] %s1925_s12 }
   0xa   :  { %v295_v12 = vld [vmem:[%s3192_s1 + $0x10] sm:$0xff]  ;;  %v298_v15 = vld [vmem:[%s3192_s1 + $0x28] sm:$0xff]  ;;  %v297_v16 = vld [vmem:[%s3192_s1 + $0x20] sm:$0xff] }
   0xb   :  { %v299_v14 = vld [vmem:[%s3192_s1 + $0x30] sm:$0xff]  ;;  %v302_v17 = vld [vmem:[%s3192_s1 + $0x48] sm:$0xff]  ;;  %v301_v18 = vld [vmem:[%s3192_s1 + $0x40] sm:$0xff] }
   0xc   :  { %v300_v19 = vld [vmem:[%s3192_s1 + $0x38] sm:$0xff]  ;;  %v305_v20 = vld [vmem:[%s3192_s1 + $0x60] sm:$0xff]  ;;  %v303_v22 = vld [vmem:[%s3192_s1 + $0x50] sm:$0xff] }
   0xd   :  { %100 = vperm.xlu2 %2258, %v55_v5   ;;  %v304_v21 = vld [vmem:[%s3192_s1 + $0x58] sm:$0xff]  ;;  %v307_v24 = vld [vmem:[%s3192_s1 + $0x70] sm:$0xff]  ;;  %v306_v25 = vld [vmem:[%s3192_s1 + $0x68] sm:$0xff] }
   0xe   :  { %94 = vperm.xlu1 %2257, %v53_v6   ;;  %88 = vperm.xlu0 %2256, %v51_v7   ;;  %v308_v23 = vld [vmem:[%s3192_s1 + $0x78] sm:$0xff]  ;;  %v542_v27 = vld [vmem:[%s3193_s2] sm:$0xff]  ;;  %v43_v28 = vld [vmem:[%s3191_s0 + $0x8] sm:$0xff] }
   0xf   :  { %v2213_v26 = vld [vmem:[%s3194_s3 + $0x38] sm:$0xff]  ;;  %v42_v29 = vld [vmem:[%s3191_s0] sm:$0xff]  ;;  %v2212_v30 = vld [vmem:[%s3194_s3 + $0x30] sm:$0xff] }
  0x10   :  { %2236 = vmatpush.bf16.msra.mxu1 %v2213_v26  ;;  %228 = vmatpush.bf16.msra.mxu0 %v2213_v26  ;;  %v2211_v31 = vld [vmem:[%s3194_s3 + $0x28] sm:$0xff]  ;;  %v45_v32 = vld [vmem:[%s3191_s0 + $0x18] sm:$0xff]  ;;  %v44_v33 = vld [vmem:[%s3191_s0 + $0x10] sm:$0xff] }
  0x11   :  { %v543_v34 = vld [vmem:[%s3193_s2 + $0x8] sm:$0xff]  ;;  %v2210_v35 = vld [vmem:[%s3194_s3 + $0x20] sm:$0xff]  ;;  %v2209_v36 = vld [vmem:[%s3194_s3 + $0x18] sm:$0xff] }
  0x12   :  { %v46_v37 = vld [vmem:[%s3191_s0 + $0x20] sm:$0xff]  ;;  %v545_v38 = vld [vmem:[%s3193_s2 + $0x18] sm:$0xff]  ;;  %v544_v39 = vld [vmem:[%s3193_s2 + $0x10] sm:$0xff] }
  0x13   :  { %v2208_v40 = vld [vmem:[%s3194_s3 + $0x10] sm:$0xff]  ;;  %v2207_v41 = vld [vmem:[%s3194_s3 + $0x8] sm:$0xff]  ;;  %v546_v43 = vld [vmem:[%s3193_s2 + $0x20] sm:$0xff] }
  0x14   :  { %2237 = vmatpush.bf16.msra.mxu1 %v2212_v30  ;;  %229 = vmatpush.bf16.msra.mxu0 %v2212_v30  ;;  %v547_v42 = vld [vmem:[%s3193_s2 + $0x28] sm:$0xff]  ;;  %v2206_v45 = vld [vmem:[%s3194_s3] sm:$0xff]  ;;  %v548_v46 = vld [vmem:[%s3193_s2 + $0x30] sm:$0xff] }
  0x15   :  { %310 = vperm.xlu2 %2258, %v293_v8   ;;  %v47_v44 = vld [vmem:[%s3191_s0 + $0x28] sm:$0xff]  ;;  %v49_v47 = vld [vmem:[%s3191_s0 + $0x38] sm:$0xff]  ;;  %v48_v48 = vld [vmem:[%s3191_s0 + $0x30] sm:$0xff]  ;;  %v2378_v8 = vmov 1.0|1.0  }
  0x16   :  { %106 = vperm.xlu1 %2257, %v57_v9   ;;  %103 = vperm.xlu0 %2256, %v56_v10   ;;  %v2221_v49 = vld [vmem:[%s3195_s4 + $0x38] sm:$0xff]  ;;  %v551_v51 = vld [vmem:[%s3193_s2 + $0x48] sm:$0xff]  ;;  %v2220_v52 = vld [vmem:[%s3195_s4 + $0x30] sm:$0xff] }
  0x17   :  { %v550_v53 = vld [vmem:[%s3193_s2 + $0x40] sm:$0xff]  ;;  %v549_v54 = vld [vmem:[%s3193_s2 + $0x38] sm:$0xff]  ;;  %v552_v58 = vld [vmem:[%s3193_s2 + $0x50] sm:$0xff] }
  0x18   :  { %2238 = vmatpush.bf16.msra.mxu1 %v2211_v31  ;;  %230 = vmatpush.bf16.msra.mxu0 %v2211_v31  ;;  %v554_v56 = vld [vmem:[%s3193_s2 + $0x60] sm:$0xff]  ;;  %v553_v57 = vld [vmem:[%s3193_s2 + $0x58] sm:$0xff]  ;;  %v2219_v59 = vld [vmem:[%s3195_s4 + $0x28] sm:$0xff] }
  0x19   :  { %v557_v63 = vld [vmem:[%s3193_s2 + $0x78] sm:$0xff]  ;;  %v2218_v0 = vld [vmem:[%s3195_s4 + $0x20] sm:$0xff]  ;;  %v556_v2 = vld [vmem:[%s3193_s2 + $0x70] sm:$0xff] }
  0x1a   :  { %v555_v3 = vld [vmem:[%s3193_s2 + $0x68] sm:$0xff]  ;;  %v2229_v7 = vld [vmem:[%s3196_s5 + $0x38] sm:$0xff] }
  0x1b   :  { %v2217_v9 = vld [vmem:[%s3195_s4 + $0x18] sm:$0xff]  ;;  %726 = vmatpush.bf16.msra.mxu2 %v2229_v7 }
  0x1c   :  { %2239 = vmatpush.bf16.msra.mxu1 %v2210_v35  ;;  %231 = vmatpush.bf16.msra.mxu0 %v2210_v35 }
  0x1d   :  { %319 = vperm.xlu2 %2258, %v296_v11   ;;  %v2228_v11 = vld [vmem:[%s3196_s5 + $0x30] sm:$0xff] }
  0x1e   :  { %316 = vperm.xlu1 %2257, %v295_v12   ;;  %313 = vperm.xlu0 %2256, %v294_v13  }
  0x1f   :  { %727 = vmatpush.bf16.msra.mxu2 %v2228_v11 }
  0x20   :  { %2240 = vmatpush.bf16.msra.mxu1 %v2209_v36  ;;  %232 = vmatpush.bf16.msra.mxu0 %v2209_v36 }
  0x24   :  { %2241 = vmatpush.bf16.msra.mxu1 %v2208_v40  ;;  %233 = vmatpush.bf16.msra.mxu0 %v2208_v40 }
  0x25   :  { %328 = vperm.xlu2 %2258, %v299_v14   ;;  %v2216_v14 = vld [vmem:[%s3195_s4 + $0x10] sm:$0xff] }
  0x26   :  { %325 = vperm.xlu1 %2257, %v298_v15   ;;  %322 = vperm.xlu0 %2256, %v297_v16   ;;  %v2227_v15 = vld [vmem:[%s3196_s5 + $0x28] sm:$0xff]  ;;  %v2226_v16 = vld [vmem:[%s3196_s5 + $0x20] sm:$0xff] }
  0x27   :  { %728 = vmatpush.bf16.msra.mxu2 %v2227_v15 }
  0x28   :  { %2242 = vmatpush.bf16.msra.mxu1 %v2207_v41  ;;  %234 = vmatpush.bf16.msra.mxu0 %v2207_v41 }
  0x2b   :  { %729 = vmatpush.bf16.msra.mxu2 %v2226_v16 }
  0x2c   :  { %2243 = vmatpush.bf16.msra.mxu1 %v2206_v45  ;;  %235 = vmatpush.bf16.msra.mxu0 %v2206_v45 }
  0x2d   :  { %337 = vperm.xlu2 %2258, %v302_v17  }
  0x2e   :  { %334 = vperm.xlu1 %2257, %v301_v18   ;;  %331 = vperm.xlu0 %2256, %v300_v19  }
  0x30   :  { %477 = vmatpush.bf16.msrb.mxu1 %v2221_v49 }
  0x34   :  { %478 = vmatpush.bf16.msrb.mxu1 %v2220_v52 }
  0x35   :  { %346 = vperm.xlu2 %2258, %v305_v20   ;;  %v2225_v20 = vld [vmem:[%s3196_s5 + $0x18] sm:$0xff] }
  0x36   :  { %343 = vperm.xlu1 %2257, %v304_v21   ;;  %340 = vperm.xlu0 %2256, %v303_v22   ;;  %v2215_v21 = vld [vmem:[%s3195_s4 + $0x8] sm:$0xff]  ;;  %v2224_v22 = vld [vmem:[%s3196_s5 + $0x10] sm:$0xff] }
  0x37   :  { %730 = vmatpush.bf16.msra.mxu2 %v2225_v20 }
  0x38   :  { %479 = vmatpush.bf16.msrb.mxu1 %v2219_v59 }
  0x3b   :  { %731 = vmatpush.bf16.msra.mxu2 %v2224_v22 }
  0x3c   :  { %480 = vmatpush.bf16.msrb.mxu1 %v2218_v0 }
  0x3d   :  { %355 = vperm.xlu2 %2258, %v308_v23  }
  0x3e   :  { %352 = vperm.xlu1 %2257, %v307_v24   ;;  %349 = vperm.xlu0 %2256, %v306_v25  }
  0x40   :  { %481 = vmatpush.bf16.msrb.mxu1 %v2217_v9 }
  0x44   :  { %482 = vmatpush.bf16.msrb.mxu1 %v2216_v14 }
  0x45   :  { %559 = vperm.xlu2 %2258, %v542_v27   ;;  %v2214_v27 = vld [vmem:[%s3195_s4] sm:$0xff] }
  0x46   :  { %64 = vperm.xlu1 %2257, %v43_v28   ;;  %61 = vperm.xlu0 %2256, %v42_v29   ;;  %v2223_v28 = vld [vmem:[%s3196_s5 + $0x8] sm:$0xff]  ;;  %v2222_v29 = vld [vmem:[%s3196_s5] sm:$0xff] }
  0x47   :  { %732 = vmatpush.bf16.msra.mxu2 %v2223_v28 }
  0x48   :  { %483 = vmatpush.bf16.msrb.mxu1 %v2215_v21 }
  0x4b   :  { %733 = vmatpush.bf16.msra.mxu2 %v2222_v29 }
  0x4c   :  { %484 = vmatpush.bf16.msrb.mxu1 %v2214_v27  ;;  %v2235_v27 = vld [vmem:[%s3197_s6 + $0x28] sm:$0xff] }
  0x4d   :  { %70 = vperm.xlu2 %2258, %v45_v32   ;;  %1136 = vmatpush.bf16.msrb.mxu0 %v2235_v27 }
  0x4e   :  { %67 = vperm.xlu1 %2257, %v44_v33   ;;  %562 = vperm.xlu0 %2256, %v543_v34  }
  0x55   :  { %73 = vperm.xlu2 %2258, %v46_v37  }
  0x56   :  { %568 = vperm.xlu1 %2257, %v545_v38   ;;  %565 = vperm.xlu0 %2256, %v544_v39  }
  0x5d   :  { %574 = vperm.xlu2 %2258, %v547_v42  }
  0x5e   :  { %571 = vperm.xlu1 %2257, %v546_v43   ;;  %76 = vperm.xlu0 %2256, %v47_v44  }
  0x5f   :  { %v2588_v50 = vpop.permute.xlu2 %97 }
  0x60   :  { %vm120_vm9 = vcmp.eq.s32.totalorder %v2588_v50, %v2631_v4 }
  0x65   :  { %577 = vperm.xlu2 %2258, %v548_v46  }
  0x66   :  { %82 = vperm.xlu1 %2257, %v49_v47   ;;  %79 = vperm.xlu0 %2256, %v48_v48  }
  0x67   :  { %v2602_v55 = vpop.permute.xlu2 %100 }
  0x68   :  { %vm121_vm10 = vcmp.eq.s32.totalorder %v2602_v55, %v2631_v4 }
  0x69   :  { %vm2010_vm11 = vmpackc.low %vm121_vm10, %vm120_vm9 }
  0x6d   :  { %586 = vperm.xlu2 %2258, %v551_v51  }
  0x6e   :  { %583 = vperm.xlu1 %2257, %v550_v53   ;;  %580 = vperm.xlu0 %2256, %v549_v54  }
  0x6f   :  { %v2622_v1 = vpop.permute.xlu2 %310 }
  0x75   :  { %595 = vperm.xlu2 %2258, %v554_v56  }
  0x76   :  { %592 = vperm.xlu1 %2257, %v553_v57   ;;  %589 = vperm.xlu0 %2256, %v552_v58  }
  0x77   :  { %v2642_v10 = vpop.permute.xlu2 %319 }
  0x78   :  { %v92_v60 = vpop.permute.xlu1 %91  ;;  %v86_v61 = vpop.permute.xlu0 %85 }
  0x79   :  { %vm116_vm1 = vcmp.eq.s32.totalorder %v86_v61, %v2631_v4  ;;  %vm118_vm3 = vcmp.eq.s32.totalorder %v92_v60, %v2631_v4 }
  0x7d   :  { %604 = vperm.xlu2 %2258, %v557_v63  }
  0x7e   :  { %601 = vperm.xlu1 %2257, %v556_v2   ;;  %598 = vperm.xlu0 %2256, %v555_v3  }
  0x7f   :  { %v329_v17 = vpop.permute.xlu2 %328 }
  0x80   :  { %v95_v5 = vpop.permute.xlu1 %94  ;;  %v89_v6 = vpop.permute.xlu0 %88  ;;  %vm363_vm15 = vcmp.eq.s32.totalorder %v329_v17, %v2631_v4 }
  0x81   :  { %vm117_vm0 = vcmp.eq.s32.totalorder %v89_v6, %v2631_v4  ;;  %vm119_vm4 = vcmp.eq.s32.totalorder %v95_v5, %v2631_v4 }
  0x82   :  { %vm2006_vm2 = vmpackc.low %vm117_vm0, %vm116_vm1 }
  0x83   :  { %2007 = vmatmul.msk.bf16.vlgmr.msra.gmra.mxu1 %vm2006_vm2, %v2378_v8  ;;  %vm2008_vm5 = vmpackc.low %vm119_vm4, %vm118_vm3 }
  0x87   :  { %v338_v25 = vpop.permute.xlu2 %337 }
  0x88   :  { %v107_v12 = vpop.permute.xlu1 %106  ;;  %v104_v13 = vpop.permute.xlu0 %103  ;;  %vm366_vm12 = vcmp.eq.s32.totalorder %v338_v25, %v2631_v4 }
  0x8f   :  { %v347_v34 = vpop.permute.xlu2 %346 }
  0x90   :  { %v2658_v18 = vpop.permute.xlu1 %316  ;;  %v2660_v19 = vpop.permute.xlu0 %313 }
  0x93   :  { %2009 = vmatmul.msk.bf16.gmra.mxu1 %vm2008_vm5, %v2378_v8  ;;  %vm123_vm5 = vcmp.eq.s32.totalorder %v107_v12, %v2631_v4 }
  0x97   :  { %v356_v38 = vpop.permute.xlu2 %355 }
  0x98   :  { %v326_v23 = vpop.permute.xlu1 %325  ;;  %v323_v24 = vpop.permute.xlu0 %322  ;;  %vm372_vm9 = vcmp.eq.s32.totalorder %v356_v38, %v2631_v4 }
  0x99   :  { %vm362_vm6 = vcmp.eq.s32.totalorder %v326_v23, %v2631_v4  ;;  %vm361_vm7 = vcmp.eq.s32.totalorder %v323_v24, %v2631_v4  ;;  %v2232_v23 = vld [vmem:[%s3197_s6 + $0x10] sm:$0xff] }
  0x9a   :  { %vm2674_vm8 = vmpackc.low %vm362_vm6, %vm361_vm7  ;;  %vm122_vm6 = vcmp.eq.s32.totalorder %v104_v13, %v2631_v4 }
  0x9b   :  { %vm2012_vm7 = vmpackc.low %vm123_vm5, %vm122_vm6  ;;  %vm357_vm5 = vcmp.eq.s32.totalorder %v2622_v1, %v2631_v4  ;;  %vm358_vm6 = vcmp.eq.s32.totalorder %v2660_v19, %v2631_v4  ;;  %v2233_v19 = vld [vmem:[%s3197_s6 + $0x18] sm:$0xff] }
  0x9c   :  { %882 = vmatpush.bf16.msrb.mxu2 %v2233_v19  ;;  %2244 = vmatpush.bf16.msra.mxu3 %v2233_v19 }
  0x9f   :  { %v560_v45 = vpop.permute.xlu2 %559 }
  0xa0   :  { %v335_v30 = vpop.permute.xlu1 %334  ;;  %v332_v31 = vpop.permute.xlu0 %331  ;;  %883 = vmatpush.bf16.msrb.mxu2 %v2232_v23  ;;  %2245 = vmatpush.bf16.msra.mxu3 %v2232_v23 }
  0xa1   :  { %vm365_vm13 = vcmp.eq.s32.totalorder %v335_v30, %v2631_v4  ;;  %vm364_vm14 = vcmp.eq.s32.totalorder %v332_v31, %v2631_v4  ;;  %v2234_v31 = vld [vmem:[%s3197_s6 + $0x20] sm:$0xff] }
  0xa2   :  { %vm2695_vm0 = vmpackc.low %vm366_vm12, %vm365_vm13  ;;  %vm369_vm12 = vcmp.eq.s32.totalorder %v347_v34, %v2631_v4  ;;  %1137 = vmatpush.bf16.msrb.mxu0 %v2234_v31 }
  0xa3   :  { %vm2699_vm1 = vmpackc.low %vm364_vm14, %vm363_vm15  ;;  %2011 = vmatmul.msk.bf16.gmra.mxu1 %vm2010_vm11, %v2378_v8 }
  0xa7   :  { %v71_v48 = vpop.permute.xlu2 %70 }
  0xa8   :  { %v344_v35 = vpop.permute.xlu1 %343  ;;  %v341_v36 = vpop.permute.xlu0 %340 }
  0xa9   :  { %vm368_vm2 = vcmp.eq.s32.totalorder %v344_v35, %v2631_v4  ;;  %vm367_vm3 = vcmp.eq.s32.totalorder %v341_v36, %v2631_v4 }
  0xaa   :  { %vm2706_vm4 = vmpackc.low %vm368_vm2, %vm367_vm3 }
  0xaf   :  { %v74_v52 = vpop.permute.xlu2 %73 }
  0xb0   :  { %v353_v39 = vpop.permute.xlu1 %352  ;;  %v350_v40 = vpop.permute.xlu0 %349 }
  0xb1   :  { %vm371_vm10 = vcmp.eq.s32.totalorder %v353_v39, %v2631_v4  ;;  %vm370_vm11 = vcmp.eq.s32.totalorder %v350_v40, %v2631_v4 }
  0xb2   :  { %vm2716_vm13 = vmpackc.low %vm372_vm9, %vm371_vm10  ;;  %vm606_vm10 = vcmp.eq.s32.totalorder %v560_v45, %v2631_v4 }
  0xb3   :  { %vm2720_vm14 = vmpackc.low %vm370_vm11, %vm369_vm12  ;;  %2013 = vmatmul.msk.bf16.gmra.mxu1 %vm2012_vm7, %v2378_v8 }
  0xb4   :  { %vm2062_vm7 = vmpackc.low %vm358_vm6, %vm357_vm5  ;;  %vm359_vm5 = vcmp.eq.s32.totalorder %v2658_v18, %v2631_v4 }
  0xb7   :  { %v575_v54 = vpop.permute.xlu2 %574 }
  0xb8   :  { %v65_v43 = vpop.permute.xlu1 %64  ;;  %v62_v44 = vpop.permute.xlu0 %61 }
  0xb9   :  { %vm109_vm15 = vcmp.eq.s32.totalorder %v65_v43, %v2631_v4  ;;  %vm108_vm2 = vcmp.eq.s32.totalorder %v62_v44, %v2631_v4 }
  0xba   :  { %vm1998_vm3 = vmpackc.low %vm109_vm15, %vm108_vm2  ;;  %vm111_vm15 = vcmp.eq.s32.totalorder %v71_v48, %v2631_v4 }
  0xbb   :  { %1999 = vmatmul.msk.bf16.vlgmr.msra.gmra.mxu0 %vm1998_vm3, %v2378_v8  ;;  %vm360_vm3 = vcmp.eq.s32.totalorder %v2642_v10, %v2631_v4 }
  0xbf   :  { %v578_v58 = vpop.permute.xlu2 %577 }
  0xc0   :  { %v563_v46 = vpop.permute.xlu0 %562  ;;  %v68_v47 = vpop.permute.xlu1 %67 }
  0xc1   :  { %vm607_vm9 = vcmp.eq.s32.totalorder %v563_v46, %v2631_v4  ;;  %vm110_vm12 = vcmp.eq.s32.totalorder %v68_v47, %v2631_v4 }
  0xc2   :  { %vm2126_vm11 = vmpackc.low %vm607_vm9, %vm606_vm10 }
  0xc3   :  { %2063 = vmatmul.msk.bf16.vlgmr.msrb.gmra.mxu1 %vm2062_vm7, %v2378_v8  ;;  %2127 = vmatmul.msk.bf16.vlgmr.msra.gmra.mxu2 %vm2126_vm11, %v2378_v8  ;;  %vm2000_vm2 = vmpackc.low %vm111_vm15, %vm110_vm12  ;;  %vm112_vm12 = vcmp.eq.s32.totalorder %v74_v52, %v2631_v4 }
  0xc4   :  { %vm2064_vm7 = vmpackc.low %vm360_vm3, %vm359_vm5  ;;  %vm611_vm3 = vcmp.eq.s32.totalorder %v575_v54, %v2631_v4 }
  0xc7   :  { %v587_v60 = vpop.permute.xlu2 %586 }
  0xc8   :  { %v566_v49 = vpop.permute.xlu0 %565  ;;  %v569_v50 = vpop.permute.xlu1 %568 }
  0xc9   :  { %vm609_vm6 = vcmp.eq.s32.totalorder %v569_v50, %v2631_v4  ;;  %vm608_vm9 = vcmp.eq.s32.totalorder %v566_v49, %v2631_v4 }
  0xca   :  { %vm2128_vm10 = vmpackc.low %vm609_vm6, %vm608_vm9 }
  0xcb   :  { %2001 = vmatmul.msk.bf16.gmra.mxu0 %vm2000_vm2, %v2378_v8 }
  0xcf   :  { %v596_v17 = vpop.permute.xlu2 %595 }
  0xd0   :  { %v77_v51 = vpop.permute.xlu0 %76  ;;  %v572_v53 = vpop.permute.xlu1 %571 }
  0xd1   :  { %vm113_vm11 = vcmp.eq.s32.totalorder %v77_v51, %v2631_v4  ;;  %vm610_vm2 = vcmp.eq.s32.totalorder %v572_v53, %v2631_v4 }
  0xd2   :  { %vm2002_vm15 = vmpackc.low %vm113_vm11, %vm112_vm12  ;;  %vm612_vm11 = vcmp.eq.s32.totalorder %v578_v58, %v2631_v4 }
  0xd3   :  { %2065 = vmatmul.msk.bf16.gmra.mxu1 %vm2064_vm7, %v2378_v8  ;;  %2129 = vmatmul.msk.bf16.gmra.mxu2 %vm2128_vm10, %v2378_v8  ;;  %vm2130_vm5 = vmpackc.low %vm611_vm3, %vm610_vm2 }
  0xd7   :  { %v605_v29 = vpop.permute.xlu2 %604 }
  0xd8   :  { %v80_v55 = vpop.permute.xlu0 %79  ;;  %v83_v56 = vpop.permute.xlu1 %82 }
  0xd9   :  { %vm115_vm6 = vcmp.eq.s32.totalorder %v83_v56, %v2631_v4  ;;  %vm114_vm9 = vcmp.eq.s32.totalorder %v80_v55, %v2631_v4 }
  0xda   :  { %vm2004_vm7 = vmpackc.low %vm115_vm6, %vm114_vm9  ;;  %vm621_vm9 = vcmp.eq.s32.totalorder %v605_v29, %v2631_v4 }
  0xdb   :  { %2003 = vmatmul.msk.bf16.gmra.mxu0 %vm2002_vm15, %v2378_v8  ;;  %vm615_vm15 = vcmp.eq.s32.totalorder %v587_v60, %v2631_v4 }
  0xe0   :  { %v581_v57 = vpop.permute.xlu0 %580  ;;  %v584_v59 = vpop.permute.xlu1 %583 }
  0xe1   :  { %vm613_vm10 = vcmp.eq.s32.totalorder %v581_v57, %v2631_v4 }
  0xe2   :  { %vm2132_vm12 = vmpackc.low %vm613_vm10, %vm612_vm11 }
  0xe3   :  { %2067 = vmatmul.msk.bf16.gmra.mxu1 %vm2674_vm8, %v2378_v8  ;;  %2131 = vmatmul.msk.bf16.gmra.mxu2 %vm2130_vm5, %v2378_v8  ;;  %vm614_vm8 = vcmp.eq.s32.totalorder %v584_v59, %v2631_v4 }
  0xe4   :  { %vm2134_vm2 = vmpackc.low %vm615_vm15, %vm614_vm8  ;;  %vm1539_vm15 = vcmask 785408  }
  0xe8   :  { %v593_v5 = vpop.permute.xlu1 %592  ;;  %v590_v6 = vpop.permute.xlu0 %589 }
  0xe9   :  { %vm616_vm3 = vcmp.eq.s32.totalorder %v590_v6, %v2631_v4 }
  0xeb   :  { %2005 = vmatmul.msk.bf16.gmra.mxu0 %vm2004_vm7, %v2378_v8 }
  0xf0   :  { %v599_v15 = vpop.permute.xlu0 %598  ;;  %v602_v26 = vpop.permute.xlu1 %601 }
  0xf1   :  { %vm619_vm5 = vcmp.eq.s32.totalorder %v599_v15, %v2631_v4 }
  0xf3   :  { %2069 = vmatmul.msk.bf16.gmra.mxu1 %vm2699_vm1, %v2378_v8  ;;  %2133 = vmatmul.msk.bf16.gmra.mxu2 %vm2132_vm12, %v2378_v8  ;;  %vm617_vm1 = vcmp.eq.s32.totalorder %v593_v5, %v2631_v4 }
 0x100   :  { %v257_v61 = vpop.f32.mrf.mxu1 }
 0x101   :  { %v2771_v63 = vpack.c.bf16 %v257_v61, %v257_v61 }
 0x103   :  { %2071 = vmatmul.msk.bf16.gmra.mxu1 %vm2695_vm0, %v2378_v8  ;;  %2135 = vmatmul.msk.bf16.gmra.mxu2 %vm2134_vm2, %v2378_v8  ;;  %v949_v2 = vunpack.c.l.b16 %v2771_v63  ;;  %vm2136_vm0 = vmpackc.low %vm617_vm1, %vm616_vm3 }
 0x108   :  { %v259_v0 = vpop.f32.mrf.mxu1 }
 0x109   :  { %v2773_v1 = vpack.c.bf16 %v259_v0, %v259_v0 }
 0x10b   :  { %v950_v3 = vunpack.c.l.b16 %v2773_v1 }
 0x10d   :  { %v2777_v7 = vpack.c.b16 %v950_v3, %v949_v2 }
 0x110   :  { %v262_v9 = vpop.f32.mrf.mxu1 }
 0x111   :  { %v2785_v10 = vpack.c.bf16 %v262_v9, %v262_v9 }
 0x113   :  { %2073 = vmatmul.msk.bf16.gmra.mxu1 %vm2706_vm4, %v2378_v8  ;;  %2137 = vmatmul.msk.bf16.gmra.mxu2 %vm2136_vm0, %v2378_v8  ;;  %v951_v13 = vunpack.c.l.b16 %v2785_v10  ;;  %vm618_vm4 = vcmp.eq.s32.totalorder %v596_v17, %v2631_v4 }
 0x114   :  { %vm2138_vm6 = vmpackc.low %vm619_vm5, %vm618_vm4 }
 0x118   :  { %v264_v11 = vpop.f32.mrf.mxu1 }
 0x119   :  { %v2787_v12 = vpack.c.bf16 %v264_v11, %v264_v11 }
 0x11b   :  { %v952_v14 = vunpack.c.l.b16 %v2787_v12 }
 0x11d   :  { %v2791_v16 = vpack.c.b16 %v952_v14, %v951_v13 }
 0x120   :  { %v267_v18 = vpop.f32.mrf.mxu1 }
 0x121   :  { %v2802_v20 = vpack.c.bf16 %v267_v18, %v267_v18 }
 0x123   :  { %2075 = vmatmul.msk.bf16.gmra.mxu1 %vm2720_vm14, %v2378_v8  ;;  %2139 = vmatmul.msk.bf16.gmra.mxu2 %vm2138_vm6, %v2378_v8  ;;  %v953_v24 = vunpack.c.l.b16 %v2802_v20  ;;  %vm620_vm14 = vcmp.eq.s32.totalorder %v602_v26, %v2631_v4 }
 0x124   :  { %vm2140_vm7 = vmpackc.low %vm621_vm9, %vm620_vm14 }
 0x128   :  { %v269_v21 = vpop.f32.mrf.mxu1 }
 0x129   :  { %v2804_v22 = vpack.c.bf16 %v269_v21, %v269_v21 }
 0x12b   :  { %v954_v25 = vunpack.c.l.b16 %v2804_v22 }
 0x12d   :  { %v2814_v28 = vpack.c.b16 %v954_v25, %v953_v24 }
 0x130   :  { %v272_v30 = vpop.f32.mrf.mxu1 }
 0x131   :  { %v2825_v32 = vpack.c.bf16 %v272_v30, %v272_v30 }
 0x133   :  { %2077 = vmatmul.msk.bf16.gmra.mxu1 %vm2716_vm13, %v2378_v8  ;;  %2141 = vmatmul.msk.bf16.gmra.mxu2 %vm2140_vm7, %v2378_v8  ;;  %v955_v36 = vunpack.c.l.b16 %v2825_v32  ;;  %vm851_vm13 = vcmask 261120  }
 0x138   :  { %v237_v33 = vpop.f32.mrf.mxu0  ;;  %v274_v34 = vpop.f32.mrf.mxu1 }
 0x139   :  { %v2827_v35 = vpack.c.bf16 %v274_v34, %v274_v34  ;;  %v2833_v39 = vpack.c.bf16 %v237_v33, %v237_v33  ;;  %v2231_v33 = vld [vmem:[%s3197_s6 + $0x8] sm:$0xff] }
 0x13a   :  { %1007 = vmatpush.bf16.msrb.mxu3 %v2231_v33 }
 0x13b   :  { %v956_v37 = vunpack.c.l.b16 %v2827_v35  ;;  %v941_v8 = vunpack.c.l.b16 %v2833_v39 }
 0x13d   :  { %v2831_v38 = vpack.c.b16 %v956_v37, %v955_v36 }
 0x140   :  { %v239_v40 = vpop.f32.mrf.mxu0  ;;  %v486_v41 = vpop.f32.mrf.mxu1 }
 0x141   :  { %v2835_v42 = vpack.c.bf16 %v239_v40, %v239_v40  ;;  %v526_v44 = vpack.c.bf16 %v486_v41, %v486_v41 }
 0x143   :  { %v942_v43 = vunpack.c.l.b16 %v2835_v42  ;;  %v1706_v47 = vunpack.c.l.bf16 %v526_v44  ;;  %v815_v52 = vunpack.c.l.b16 %v526_v44 }
 0x145   :  { %v2839_v45 = vpack.c.b16 %v942_v43, %v941_v8  ;;  %v1794_v53 = vmul.f32 %v1706_v47, %v1706_v47 }
 0x146   :  { %v735_v46 = vpop.f32.mrf.mxu2 }
 0x147   :  { %v775_v50 = vpack.c.bf16 %v735_v46, %v735_v46  ;;  %v1810_v61 = vsel %vm851_vm13, %v1794_v53, 0.0 }
 0x148   :  { %v242_v48 = vpop.f32.mrf.mxu0  ;;  %v488_v49 = vpop.f32.mrf.mxu1 }
 0x149   :  { %v527_v51 = vpack.c.bf16 %v488_v49, %v488_v49  ;;  %v1722_v56 = vunpack.c.l.bf16 %v775_v50  ;;  %v2841_v59 = vpack.c.bf16 %v242_v48, %v242_v48  ;;  %v1070_v5 = vunpack.c.l.b16 %v775_v50 }
 0x14b   :  { %v816_v54 = vunpack.c.l.b16 %v527_v51  ;;  %v1707_v55 = vunpack.c.l.bf16 %v527_v51  ;;  %v1850_v13 = vmul.f32 %v1722_v56, %v1722_v56  ;;  %v943_v18 = vunpack.c.l.b16 %v2841_v59 }
 0x14d   :  { %v831_v57 = vpack.c.b16 %v816_v54, %v815_v52  ;;  %v1795_v58 = vmul.f32 %v1707_v55, %v1707_v55  ;;  %v1866_v26 = vsel %vm851_vm13, %v1850_v13, 0.0 }
 0x14e   :  { %v737_v60 = vpop.f32.mrf.mxu2 }
 0x14f   :  { %v1811_v0 = vsel %vm851_vm13, %v1795_v58, 0.0  ;;  %v776_v2 = vpack.c.bf16 %v737_v60, %v737_v60  ;;  %2150 = vmatmul.msk.bf16.vlgmr.msrb.gmra.mxu2 %vm851_vm13, %v831_v57  ;;  %v1691_v58 = vunpack.c.l.bf16 %v2835_v42 }
 0x150   :  { %v244_v3 = vpop.f32.mrf.mxu0  ;;  %v1812_v6 = vadd.f32 %v1811_v0, %v1810_v61  ;;  %v491_v11 = vpop.f32.mrf.mxu1 }
 0x151   :  { %v2846_v9 = vpack.c.bf16 %v244_v3, %v244_v3  ;;  %v1071_v14 = vunpack.c.l.b16 %v776_v2  ;;  %v1723_v15 = vunpack.c.l.bf16 %v776_v2  ;;  %v528_v17 = vpack.c.bf16 %v491_v11, %v491_v11 }
 0x152   :  { %v1692_v11 = vunpack.c.l.bf16 %v2841_v59 }
 0x153   :  { %v944_v19 = vunpack.c.l.b16 %v2846_v9  ;;  %v1086_v21 = vpack.c.b16 %v1071_v14, %v1070_v5  ;;  %v1851_v23 = vmul.f32 %v1723_v15, %v1723_v15  ;;  %v1708_v24 = vunpack.c.l.bf16 %v528_v17 }
 0x154   :  { %v817_v44 = vunpack.c.l.b16 %v528_v17 }
 0x155   :  { %v2850_v25 = vpack.c.b16 %v944_v19, %v943_v18  ;;  %v1867_v27 = vsel %vm851_vm13, %v1851_v23, 0.0  ;;  %v1796_v29 = vmul.f32 %v1708_v24, %v1708_v24  ;;  %2182 = vmatmul.msk.bf16.vlgmr.msrb.gmra.mxu0 %vm851_vm13, %v1086_v21  ;;  %v1739_v18 = vmul.f32 %v1691_v58, %v1691_v58 }
 0x156   :  { %v1868_v30 = vadd.f32 %v1867_v27, %v1866_v26  ;;  %v740_v31 = vpop.f32.mrf.mxu2  ;;  %v1693_v19 = vunpack.c.l.bf16 %v2846_v9  ;;  %v1740_v24 = vmul.f32 %v1692_v11, %v1692_v11  ;;  %v1698_v58 = vunpack.c.l.bf16 %v2771_v63 }
 0x157   :  { %v1813_v34 = vsel %vm851_vm13, %v1796_v29, 0.0  ;;  %v777_v36 = vpack.c.bf16 %v740_v31, %v740_v31  ;;  %v1700_v63 = vunpack.c.l.bf16 %v2785_v10  ;;  %v1702_v10 = vunpack.c.l.bf16 %v2802_v20 }
 0x158   :  { %v247_v37 = vpop.f32.mrf.mxu0  ;;  %v1814_v40 = vadd.f32 %v1813_v34, %v1812_v6  ;;  %v493_v41 = vpop.f32.mrf.mxu1  ;;  %v1690_v6 = vunpack.c.l.bf16 %v2833_v39  ;;  %v1741_v31 = vmul.f32 %v1693_v19, %v1693_v19 }
 0x159   :  { %v1724_v8 = vunpack.c.l.bf16 %v777_v36  ;;  %v529_v43 = vpack.c.bf16 %v493_v41, %v493_v41  ;;  %v281_v53 = vpack.c.bf16 %v247_v37, %v247_v37  ;;  %v1072_v2 = vunpack.c.l.b16 %v777_v36 }
 0x15a   :  { %v1738_v23 = vmul.f32 %v1690_v6, %v1690_v6 }
 0x15b   :  { %v1852_v46 = vmul.f32 %v1724_v8, %v1724_v8  ;;  %v818_v47 = vunpack.c.l.b16 %v529_v43  ;;  %v1709_v48 = vunpack.c.l.bf16 %v529_v43  ;;  %v945_v13 = vunpack.c.l.b16 %v281_v53 }
 0x15c   :  { %v1694_v26 = vunpack.c.l.bf16 %v281_v53  ;;  %v1754_v37 = vsel %vm851_vm13, %v1738_v23, 0.0 }
 0x15d   :  { %v1869_v49 = vsel %vm851_vm13, %v1852_v46, 0.0  ;;  %v1797_v50 = vmul.f32 %v1709_v48, %v1709_v48  ;;  %v832_v51 = vpack.c.b16 %v818_v47, %v817_v44  ;;  %v1759_v47 = vsel %vm851_vm13, %v1741_v31, 0.0 }
 0x15e   :  { %v1870_v52 = vadd.f32 %v1869_v49, %v1868_v30  ;;  %v742_v54 = vpop.f32.mrf.mxu2  ;;  %v1755_v30 = vsel %vm851_vm13, %v1739_v18, 0.0  ;;  %v1742_v41 = vmul.f32 %v1694_v26, %v1694_v26 }
 0x15f   :  { %v1815_v55 = vsel %vm851_vm13, %v1797_v50, 0.0  ;;  %v778_v56 = vpack.c.bf16 %v742_v54, %v742_v54  ;;  %2151 = vmatmul.msk.bf16.gmra.mxu2 %vm851_vm13, %v832_v51  ;;  %v1756_v43 = vadd.f32 %v1755_v30, %v1754_v37 }
 0x160   :  { %v249_v57 = vpop.f32.mrf.mxu0  ;;  %v2863_v60 = vadd.f32 %v1815_v55, %v1814_v40  ;;  %v496_v0 = vpop.f32.mrf.mxu1  ;;  %v1757_v40 = vsel %vm851_vm13, %v1740_v24, 0.0 }
 0x161   :  { %v282_v61 = vpack.c.bf16 %v249_v57, %v249_v57  ;;  %v1073_v3 = vunpack.c.l.b16 %v778_v56  ;;  %v1725_v5 = vunpack.c.l.bf16 %v778_v56  ;;  %v2874_v59 = vpack.c.bf16 %v496_v0, %v496_v0 }
 0x162   :  { %v1758_v49 = vadd.f32 %v1757_v40, %v1756_v43 }
 0x163   :  { %v946_v14 = vunpack.c.l.b16 %v282_v61  ;;  %v1853_v15 = vmul.f32 %v1725_v5, %v1725_v5  ;;  %v1087_v17 = vpack.c.b16 %v1073_v3, %v1072_v2  ;;  %v1695_v33 = vunpack.c.l.bf16 %v282_v61 }
 0x164   :  { %v819_v44 = vunpack.c.l.b16 %v2874_v59  ;;  %v1760_v55 = vadd.f32 %v1759_v47, %v1758_v49  ;;  %v1699_v3 = vunpack.c.l.bf16 %v2773_v1  ;;  %v1750_v49 = vmul.f32 %v1702_v10, %v1702_v10 }
 0x165   :  { %v2868_v21 = vpack.c.b16 %v946_v14, %v945_v13  ;;  %v1871_v42 = vsel %vm851_vm13, %v1853_v15, 0.0  ;;  %2183 = vmatmul.msk.bf16.gmra.mxu0 %vm851_vm13, %v1087_v17  ;;  %v1743_v48 = vmul.f32 %v1695_v33, %v1695_v33 }
 0x166   :  { %v2872_v27 = vadd.f32 %v1871_v42, %v1870_v52  ;;  %v745_v39 = vpop.f32.mrf.mxu2  ;;  %v1761_v52 = vsel %vm851_vm13, %v1742_v41, 0.0  ;;  %v1746_v42 = vmul.f32 %v1698_v58, %v1698_v58  ;;  %v1747_v1 = vmul.f32 %v1699_v3, %v1699_v3 }
 0x167   :  { %v2884_v50 = vpack.c.bf16 %v745_v39, %v745_v39  ;;  %v1763_v61 = vsel %vm851_vm13, %v1743_v48, 0.0  ;;  %v1762_v5 = vadd.f32 %v1761_v52, %v1760_v55  ;;  %v1701_v39 = vunpack.c.l.bf16 %v2787_v12 }
 0x168   :  { %v252_v29 = vpop.f32.mrf.mxu0  ;;  %v498_v34 = vpop.f32.mrf.mxu1  ;;  %v1703_v12 = vunpack.c.l.bf16 %v2804_v22  ;;  %v1705_v22 = vunpack.c.l.bf16 %v2827_v35 }
 0x169   :  { %v283_v9 = vpack.c.bf16 %v252_v29, %v252_v29  ;;  %v2877_v36 = vpack.c.bf16 %v498_v34, %v498_v34  ;;  %v1074_v6 = vunpack.c.l.b16 %v2884_v50  ;;  %v1764_v18 = vadd.f32 %v1763_v61, %v1762_v5 }
 0x16a   :  { %v1748_v34 = vmul.f32 %v1700_v63, %v1700_v63  ;;  %v1749_v43 = vmul.f32 %v1701_v39, %v1701_v39 }
 0x16b   :  { %v1696_v8 = vunpack.c.l.bf16 %v283_v9  ;;  %v820_v46 = vunpack.c.l.b16 %v2877_v36  ;;  %v947_v13 = vunpack.c.l.b16 %v283_v9  ;;  %v1769_v9 = vsel %vm851_vm13, %v1746_v42, 0.0 }
 0x16c   :  { %v1773_v48 = vsel %vm851_vm13, %v1748_v34, 0.0 }
 0x16d   :  { %v833_v51 = vpack.c.b16 %v820_v46, %v819_v44  ;;  %v1744_v53 = vmul.f32 %v1696_v8, %v1696_v8  ;;  %v1771_v8 = vsel %vm851_vm13, %v1747_v1, 0.0 }
 0x16e   :  { %v747_v54 = vpop.f32.mrf.mxu2 }
 0x16f   :  { %v2887_v56 = vpack.c.bf16 %v747_v54, %v747_v54  ;;  %2152 = vmatmul.msk.bf16.vlgmr.msra.gmra.mxu3 %vm851_vm13, %v833_v51  ;;  %v1765_v14 = vsel %vm851_vm13, %v1744_v53, 0.0  ;;  %v1704_v51 = vunpack.c.l.bf16 %v2825_v32  ;;  %v1775_v54 = vsel %vm851_vm13, %v1749_v43, 0.0 }
 0x170   :  { %v254_v57 = vpop.f32.mrf.mxu0  ;;  %v501_v2 = vpop.f32.mrf.mxu1  ;;  %v1766_v26 = vadd.f32 %v1765_v14, %v1764_v18 }
 0x171   :  { %v284_v0 = vpack.c.bf16 %v254_v57, %v254_v57  ;;  %v1075_v11 = vunpack.c.l.b16 %v2887_v56  ;;  %v2902_v33 = vpack.c.bf16 %v501_v2, %v501_v2  ;;  %v1751_v57 = vmul.f32 %v1703_v12, %v1703_v12 }
 0x172   :  { %v1752_v3 = vmul.f32 %v1704_v51, %v1704_v51  ;;  %v1710_v51 = vunpack.c.l.bf16 %v2874_v59 }
 0x173   :  { %v948_v15 = vunpack.c.l.b16 %v284_v0  ;;  %v1697_v17 = vunpack.c.l.bf16 %v284_v0  ;;  %v1088_v19 = vpack.c.b16 %v1075_v11, %v1074_v6  ;;  %v821_v46 = vunpack.c.l.b16 %v2902_v33 }
 0x174   :  { %v1777_v0 = vsel %vm851_vm13, %v1750_v49, 0.0  ;;  %v1779_v11 = vsel %vm851_vm13, %v1751_v57, 0.0  ;;  %v1781_v35 = vsel %vm851_vm13, %v1752_v3, 0.0  ;;  %v1588_v49 = vld [vmem:[#allocation2] sm:$0x1]  ;;  %v1712_v3 = vunpack.c.l.bf16 %v2902_v33 }
 0x175   :  { %v1745_v23 = vmul.f32 %v1697_v17, %v1697_v17  ;;  %v2897_v24 = vpack.c.b16 %v948_v15, %v947_v13  ;;  %2184 = vmatmul.msk.bf16.gmra.mxu0 %vm851_vm13, %v1088_v19  ;;  %v1753_v13 = vmul.f32 %v1705_v22, %v1705_v22  ;;  %v2230_v19 = vld [vmem:[%s3197_s6] sm:$0xff] }
 0x176   :  { %v750_v30 = vpop.f32.mrf.mxu2  ;;  %1008 = vmatpush.bf16.msrb.mxu3 %v2230_v19 }
 0x177   :  { %v1767_v29 = vsel %vm851_vm13, %v1745_v23, 0.0  ;;  %v2914_v20 = vpack.c.bf16 %v750_v30, %v750_v30  ;;  %v1783_v63 = vsel %vm851_vm13, %v1753_v13, 0.0 }
 0x178   :  { %v1768_v31 = vadd.f32 %v1767_v29, %v1766_v26  ;;  %v503_v37 = vpop.f32.mrf.mxu1 }
 0x179   :  { %v2906_v41 = vpack.c.bf16 %v503_v37, %v503_v37  ;;  %v1076_v32 = vunpack.c.l.b16 %v2914_v20 }
 0x17a   :  { %v1770_v40 = vadd.f32 %v1769_v9, %v1768_v31 }
 0x17b   :  { %v822_v47 = vunpack.c.l.b16 %v2906_v41 }
 0x17c   :  { %v1772_v44 = vadd.f32 %v1771_v8, %v1770_v40 }
 0x17d   :  { %v834_v52 = vpack.c.b16 %v822_v47, %v821_v46 }
 0x17e   :  { %v1774_v53 = vadd.f32 %v1773_v48, %v1772_v44  ;;  %v752_v55 = vpop.f32.mrf.mxu2 }
 0x17f   :  { %v2918_v58 = vpack.c.bf16 %v752_v55, %v752_v55  ;;  %2153 = vmatmul.msk.bf16.gmra.mxu3 %vm851_vm13, %v834_v52  ;;  %v1726_v52 = vunpack.c.l.bf16 %v2884_v50  ;;  %v1711_v55 = vunpack.c.l.bf16 %v2877_v36  ;;  %v1713_v36 = vunpack.c.l.bf16 %v2906_v41 }
 0x180   :  { %v1776_v61 = vadd.f32 %v1775_v54, %v1774_v53  ;;  %v506_v2 = vpop.f32.mrf.mxu1 }
 0x181   :  { %v1077_v5 = vunpack.c.l.b16 %v2918_v58  ;;  %v2930_v42 = vpack.c.bf16 %v506_v2, %v506_v2  ;;  %v1854_v2 = vmul.f32 %v1726_v52, %v1726_v52 }
 0x182   :  { %v1778_v6 = vadd.f32 %v1777_v0, %v1776_v61  ;;  %v1798_v61 = vmul.f32 %v1710_v51, %v1710_v51 }
 0x183   :  { %v1089_v14 = vpack.c.b16 %v1077_v5, %v1076_v32  ;;  %v823_v39 = vunpack.c.l.b16 %v2930_v42  ;;  %v1799_v32 = vmul.f32 %v1711_v55, %v1711_v55  ;;  %v1727_v5 = vunpack.c.l.bf16 %v2887_v56 }
 0x184   :  { %v1780_v15 = vadd.f32 %v1779_v11, %v1778_v6  ;;  %v1817_v11 = vsel %vm851_vm13, %v1798_v61, 0.0  ;;  %v1873_v13 = vsel %vm851_vm13, %v1854_v2, 0.0  ;;  %v1714_v56 = vunpack.c.l.bf16 %v2930_v42 }
 0x185   :  { %2185 = vmatmul.msk.bf16.gmra.mxu0 %vm851_vm13, %v1089_v14  ;;  %v1800_v14 = vmul.f32 %v1712_v3, %v1712_v3  ;;  %v1855_v33 = vmul.f32 %v1727_v5, %v1727_v5  ;;  %v1818_v19 = vadd.f32 %v1817_v11, %v2863_v60 }
 0x186   :  { %v755_v17 = vpop.f32.mrf.mxu2  ;;  %v1782_v18 = vadd.f32 %v1781_v35, %v1780_v15  ;;  %v1819_v15 = vsel %vm851_vm13, %v1799_v32, 0.0  ;;  %v1728_v35 = vunpack.c.l.bf16 %v2914_v20  ;;  %v1802_v60 = vmul.f32 %v1714_v56, %v1714_v56 }
 0x187   :  { %v2937_v30 = vpack.c.bf16 %v755_v17, %v755_v17  ;;  %v1801_v17 = vmul.f32 %v1713_v36, %v1713_v36 }
 0x188   :  { %v508_v23 = vpop.f32.mrf.mxu1  ;;  %v1784_v26 = vadd.f32 %v1783_v63, %v1782_v18 }
 0x189   :  { %v2933_v1 = vpack.c.bf16 %v508_v23, %v508_v23  ;;  %v1078_v37 = vunpack.c.l.b16 %v2937_v30  ;;  %v1823_v20 = vsel %vm851_vm13, %v1801_v17, 0.0 }
 0x18a   :  { %1785 = vadd.xlane.f32.xlu0 %v1784_v26  ;;  %v1874_v26 = vadd.f32 %v1873_v13, %v2872_v27 }
 0x18b   :  { %v824_v29 = vunpack.c.l.b16 %v2933_v1  ;;  %v1715_v63 = vunpack.c.l.bf16 %v2933_v1 }
 0x18d   :  { %v835_v31 = vpack.c.b16 %v824_v29, %v823_v39  ;;  %v1820_v39 = vadd.f32 %v1819_v15, %v1818_v19  ;;  %v1821_v29 = vsel %vm851_vm13, %v1800_v14, 0.0  ;;  %v1803_v27 = vmul.f32 %v1715_v63, %v1715_v63 }
 0x18e   :  { %v757_v9 = vpop.f32.mrf.mxu2 }
 0x18f   :  { %v2939_v34 = vpack.c.bf16 %v757_v9, %v757_v9  ;;  %2154 = vmatmul.msk.bf16.gmra.mxu3 %vm851_vm13, %v835_v31  ;;  %v1875_v9 = vsel %vm851_vm13, %v1855_v33, 0.0  ;;  %v1822_v1 = vadd.f32 %v1821_v29, %v1820_v39 }
 0x190   :  { %v511_v10 = vpop.f32.mrf.mxu1 }
 0x191   :  { %v1079_v40 = vunpack.c.l.b16 %v2939_v34  ;;  %v2945_v12 = vpack.c.bf16 %v511_v10, %v511_v10  ;;  %v1856_v10 = vmul.f32 %v1728_v35, %v1728_v35  ;;  %v1824_v52 = vadd.f32 %v1823_v20, %v1822_v1 }
 0x193   :  { %v1090_v8 = vpack.c.b16 %v1079_v40, %v1078_v37  ;;  %v825_v47 = vunpack.c.l.b16 %v2945_v12  ;;  %v1729_v37 = vunpack.c.l.bf16 %v2918_v58  ;;  %v1716_v42 = vunpack.c.l.bf16 %v2945_v12 }
 0x194   :  { %v1877_v51 = vsel %vm851_vm13, %v1856_v10, 0.0  ;;  %v1731_v58 = vunpack.c.l.bf16 %v2939_v34  ;;  %v1825_v12 = vsel %vm851_vm13, %v1802_v60, 0.0 }
 0x195   :  { %2186 = vmatmul.msk.bf16.gmra.mxu0 %vm851_vm13, %v1090_v8 }
 0x196   :  { %v760_v43 = vpop.f32.mrf.mxu2  ;;  %v1859_v11 = vmul.f32 %v1731_v58, %v1731_v58 }
 0x197   :  { %v2953_v53 = vpack.c.bf16 %v760_v43, %v760_v43  ;;  %v1730_v43 = vunpack.c.l.bf16 %v2937_v30 }
 0x198   :  { %v513_v44 = vpop.f32.mrf.mxu1 }
 0x199   :  { %v2947_v46 = vpack.c.bf16 %v513_v44, %v513_v44  ;;  %v1080_v59 = vunpack.c.l.b16 %v2953_v53  ;;  %v1858_v30 = vmul.f32 %v1730_v43, %v1730_v43  ;;  %v1732_v2 = vunpack.c.l.bf16 %v2953_v53 }
 0x19b   :  { %v826_v48 = vunpack.c.l.b16 %v2947_v46  ;;  %v1717_v44 = vunpack.c.l.bf16 %v2947_v46  ;;  %v1827_v46 = vsel %vm851_vm13, %v1803_v27, 0.0  ;;  %v1860_v53 = vmul.f32 %v1732_v2, %v1732_v2 }
 0x19c   :  { %v1881_v19 = vsel %vm851_vm13, %v1858_v30, 0.0 }
 0x19d   :  { %v836_v54 = vpack.c.b16 %v826_v48, %v825_v47  ;;  %v1876_v47 = vadd.f32 %v1875_v9, %v1874_v26  ;;  %v1805_v3 = vmul.f32 %v1717_v44, %v1717_v44  ;;  %v1885_v60 = vsel %vm851_vm13, %v1860_v53, 0.0 }
 0x19e   :  { %1591 = vperm.xlu0 %2256, %v1588_v49   ;;  %v762_v57 = vpop.f32.mrf.mxu2 }
 0x19f   :  { %v2956_v22 = vpack.c.bf16 %v762_v57, %v762_v57  ;;  %2155 = vmatmul.msk.bf16.gmra.mxu3 %vm851_vm13, %v836_v54  ;;  %v1857_v54 = vmul.f32 %v1729_v37, %v1729_v37  ;;  %v1804_v57 = vmul.f32 %v1716_v42, %v1716_v42  ;;  %v1878_v17 = vadd.f32 %v1877_v51, %v1876_v47 }
 0x1a0   :  { %v516_v0 = vpop.f32.mrf.mxu1  ;;  %v1831_v56 = vsel %vm851_vm13, %v1805_v3, 0.0 }
 0x1a1   :  { %v1081_v50 = vunpack.c.l.b16 %v2956_v22  ;;  %v538_v41 = vpack.c.bf16 %v516_v0, %v516_v0  ;;  %v1879_v34 = vsel %vm851_vm13, %v1857_v54, 0.0  ;;  %v1733_v13 = vunpack.c.l.bf16 %v2956_v22 }
 0x1a2   :  { %v1829_v14 = vsel %vm851_vm13, %v1804_v57, 0.0 }
 0x1a3   :  { %v1091_v6 = vpack.c.b16 %v1081_v50, %v1080_v59  ;;  %v827_v40 = vunpack.c.l.b16 %v538_v41  ;;  %v1718_v61 = vunpack.c.l.bf16 %v538_v41  ;;  %v1861_v39 = vmul.f32 %v1733_v13, %v1733_v13 }
 0x1a5   :  { %2187 = vmatmul.msk.bf16.gmra.mxu0 %vm851_vm13, %v1091_v6  ;;  %v1826_v6 = vadd.f32 %v1825_v12, %v1824_v52  ;;  %v1806_v15 = vmul.f32 %v1718_v61, %v1718_v61  ;;  %v1887_v47 = vsel %vm851_vm13, %v1861_v39, 0.0 }
 0x1a6   :  { %v765_v18 = vpop.f32.mrf.mxu2 }
 0x1a7   :  { %v787_v48 = vpack.c.bf16 %v765_v18, %v765_v18  ;;  %v1828_v18 = vadd.f32 %v1827_v46, %v1826_v6  ;;  %v1833_v9 = vsel %vm851_vm13, %v1806_v15, 0.0 }
 0x1a8   :  { %v518_v23 = vpop.f32.mrf.mxu1 }
 0x1a9   :  { %v539_v31 = vpack.c.bf16 %v518_v23, %v518_v23  ;;  %v1082_v50 = vunpack.c.l.b16 %v787_v48  ;;  %v1734_v41 = vunpack.c.l.bf16 %v787_v48  ;;  %v1880_v23 = vadd.f32 %v1879_v34, %v1878_v17 }
 0x1aa   :  { %v1830_v26 = vadd.f32 %v1829_v14, %v1828_v18 }
 0x1ab   :  { %v828_v8 = vunpack.c.l.b16 %v539_v31  ;;  %v1719_v32 = vunpack.c.l.bf16 %v539_v31  ;;  %v1883_v31 = vsel %vm851_vm13, %v1859_v11, 0.0  ;;  %v1882_v37 = vadd.f32 %v1881_v19, %v1880_v23 }
 0x1ac   :  { %v1832_v42 = vadd.f32 %v1831_v56, %v1830_v26 }
 0x1ad   :  { %v837_v49 = vpack.c.b16 %v828_v8, %v827_v40  ;;  %v1807_v63 = vmul.f32 %v1719_v32, %v1719_v32  ;;  %v1862_v8 = vmul.f32 %v1734_v41, %v1734_v41  ;;  %v1884_v44 = vadd.f32 %v1883_v31, %v1882_v37 }
 0x1ae   :  { %v767_v55 = vpop.f32.mrf.mxu2  ;;  %v1834_v48 = vadd.f32 %v1833_v9, %v1832_v42 }
 0x1af   :  { %v788_v0 = vpack.c.bf16 %v767_v55, %v767_v55  ;;  %2156 = vmatmul.msk.bf16.gmra.mxu3 %vm851_vm13, %v837_v49  ;;  %v1835_v1 = vsel %vm851_vm13, %v1807_v63, 0.0  ;;  %v1886_v55 = vadd.f32 %v1885_v60, %v1884_v44  ;;  %v1889_v57 = vsel %vm851_vm13, %v1862_v8, 0.0 }
 0x1b0   :  { %v521_v59 = vpop.f32.mrf.mxu1  ;;  %v1836_v12 = vadd.f32 %v1835_v1, %v1834_v48 }
 0x1b1   :  { %v1083_v5 = vunpack.c.l.b16 %v788_v0  ;;  %v540_v36 = vpack.c.bf16 %v521_v59, %v521_v59  ;;  %v1735_v22 = vunpack.c.l.bf16 %v788_v0  ;;  %v1888_v46 = vadd.f32 %v1887_v47, %v1886_v55 }
 0x1b3   :  { %v1720_v33 = vunpack.c.l.bf16 %v540_v36  ;;  %v1092_v35 = vpack.c.b16 %v1083_v5, %v1082_v50  ;;  %v1863_v49 = vmul.f32 %v1735_v22, %v1735_v22  ;;  %v829_v51 = vunpack.c.l.b16 %v540_v36 }
 0x1b4   :  { %v1890_v5 = vadd.f32 %v1889_v57, %v1888_v46 }
 0x1b5   :  { %2188 = vmatmul.msk.bf16.gmra.mxu0 %vm851_vm13, %v1092_v35  ;;  %v1808_v10 = vmul.f32 %v1720_v33, %v1720_v33  ;;  %v1891_v59 = vsel %vm851_vm13, %v1863_v49, 0.0 }
 0x1b6   :  { %v770_v29 = vpop.f32.mrf.mxu2  ;;  %v1892_v14 = vadd.f32 %v1891_v59, %v1890_v5 }
 0x1b7   :  { %v789_v20 = vpack.c.bf16 %v770_v29, %v770_v29  ;;  %v1837_v58 = vsel %vm851_vm13, %v1808_v10, 0.0 }
 0x1b8   :  { %v523_v40 = vpop.f32.mrf.mxu1  ;;  %v1838_v3 = vadd.f32 %v1837_v58, %v1836_v12 }
 0x1b9   :  { %v1736_v43 = vunpack.c.l.bf16 %v789_v20  ;;  %v541_v27 = vpack.c.bf16 %v523_v40, %v523_v40  ;;  %v1084_v34 = vunpack.c.l.b16 %v789_v20 }
 0x1bb   :  { %v830_v52 = vunpack.c.l.b16 %v541_v27  ;;  %v1721_v54 = vunpack.c.l.bf16 %v541_v27  ;;  %v1864_v61 = vmul.f32 %v1736_v43, %v1736_v43 }
 0x1bd   :  { %v838_v0 = vpack.c.b16 %v830_v52, %v829_v51  ;;  %v1809_v30 = vmul.f32 %v1721_v54, %v1721_v54  ;;  %v1893_v13 = vsel %vm851_vm13, %v1864_v61, 0.0 }
 0x1be   :  { %v772_v2 = vpop.f32.mrf.mxu2  ;;  %v1894_v35 = vadd.f32 %v1893_v13, %v1892_v14 }
 0x1bf   :  { %v790_v50 = vpack.c.bf16 %v772_v2, %v772_v2  ;;  %2157 = vmatmul.msk.bf16.gmra.mxu3 %vm851_vm13, %v838_v0  ;;  %v1839_v32 = vsel %vm851_vm13, %v1809_v30, 0.0 }
 0x1c0   :  { %v1840_v36 = vadd.f32 %v1839_v32, %v1838_v3 }
 0x1c1   :  { %v1085_v6 = vunpack.c.l.b16 %v790_v50  ;;  %v1737_v11 = vunpack.c.l.bf16 %v790_v50 }
 0x1c2   :  { %1841 = vadd.xlane.f32.xlu1 %v1840_v36 }
 0x1c3   :  { %v1865_v15 = vmul.f32 %v1737_v11, %v1737_v11  ;;  %v1093_v33 = vpack.c.b16 %v1085_v6, %v1084_v34 }
 0x1c5   :  { %2189 = vmatmul.msk.bf16.gmra.mxu0 %vm851_vm13, %v1093_v33  ;;  %v1895_v17 = vsel %vm851_vm13, %v1865_v15, 0.0 }
 0x1c6   :  { %v1896_v18 = vadd.f32 %v1895_v17, %v1894_v35 }
 0x1c8   :  { %1897 = vadd.xlane.f32.xlu2 %v1896_v18 }
 0x1cf   :  { %2166 = vmatmul.msk.bf16.vlgmr.msrb.gmra.mxu3 %vm851_vm13, %v2839_v45 }
 0x1d2   :  { %v1139_v20 = vpop.f32.mrf.mxu0  ;;  %v885_v58 = vpop.f32.mrf.mxu2 }
 0x1da   :  { %v1141_v27 = vpop.f32.mrf.mxu0  ;;  %v887_v0 = vpop.f32.mrf.mxu2 }
 0x1df   :  { %2167 = vmatmul.msk.bf16.gmra.mxu3 %vm851_vm13, %v2850_v25 }
 0x1e2   :  { %v1144_v52 = vpop.f32.mrf.mxu0  ;;  %v890_v5 = vpop.f32.mrf.mxu2 }
 0x1ea   :  { %v1146_v57 = vpop.f32.mrf.mxu0 }
 0x1ef   :  { %2168 = vmatmul.msk.bf16.gmra.mxu3 %vm851_vm13, %v2868_v21 }
 0x1f2   :  { %v3011_v53 = vpop.f32.mrf.mxu3  ;;  %v1149_v50 = vpop.f32.mrf.mxu0 }
 0x1fa   :  { %v3013_v19 = vpop.f32.mrf.mxu3  ;;  %v3053_v33 = vpop.f32.mrf.mxu0 }
 0x1fd   :  { %v1786_v56 = vpop.xlane.xlu0 %1785 }
 0x1fe   :  { %v1787_v41 = vrot.slane %v1786_v56, 4 }
 0x1ff   :  { %2169 = vmatmul.msk.bf16.gmra.mxu3 %vm851_vm13, %v2897_v24 }
 0x200   :  { %v1788_v63 = vadd.f32 %v1787_v41, %v1786_v56  ;;  %v892_v56 = vpop.f32.mrf.mxu2 }
 0x202   :  { %v1789_v23 = vrot.slane %v1788_v63, 2  ;;  %v3017_v26 = vpop.f32.mrf.mxu3 }
 0x204   :  { %v1790_v45 = vadd.f32 %v1789_v23, %v1788_v63 }
 0x206   :  { %v1791_v39 = vrot.slane %v1790_v45, 1 }
 0x208   :  { %v1792_v22 = vadd.f32 %v1791_v39, %v1790_v45 }
 0x20a   :  { %v3019_v25 = vpop.f32.mrf.mxu3  ;;  %2246 = vpush %v1792_v22 }
 0x20f   :  { %2170 = vmatmul.msk.bf16.gmra.mxu3 %vm851_vm13, %v2777_v7 }
 0x212   :  { %v3023_v21 = vpop.f32.mrf.mxu3 }
 0x21a   :  { %v3025_v29 = vpop.f32.mrf.mxu3 }
 0x21f   :  { %2171 = vmatmul.msk.bf16.gmra.mxu3 %vm851_vm13, %v2791_v16 }
 0x222   :  { %v3029_v24 = vpop.f32.mrf.mxu3 }
 0x22a   :  { %v3031_v31 = vpop.f32.mrf.mxu3 }
 0x22f   :  { %2172 = vmatmul.msk.bf16.gmra.mxu3 %vm851_vm13, %v2814_v28 }
 0x232   :  { %v3035_v9 = vpop.f32.mrf.mxu3 }
 0x235   :  { %v1842_v10 = vpop.xlane.xlu1 %1841 }
 0x236   :  { %v1843_v37 = vrot.slane %v1842_v10, 4 }
 0x238   :  { %v1844_v7 = vadd.f32 %v1843_v37, %v1842_v10 }
 0x23a   :  { %v1845_v60 = vrot.slane %v1844_v7, 2  ;;  %v3037_v42 = vpop.f32.mrf.mxu3 }
 0x23b   :  { %v1898_v40 = vpop.xlane.xlu2 %1897 }
 0x23c   :  { %v1899_v8 = vrot.slane %v1898_v40, 4  ;;  %v1846_v1 = vadd.f32 %v1845_v60, %v1844_v7 }
 0x23e   :  { %v1900_v16 = vadd.f32 %v1899_v8, %v1898_v40  ;;  %v1847_v43 = vrot.slane %v1846_v1, 1 }
 0x23f   :  { %2173 = vmatmul.msk.bf16.gmra.mxu3 %vm851_vm13, %v2831_v38  ;;  %v3048_v38 = vld [vmem:[%s3198_s7] ss:$0 sm:$0xff] }
 0x240   :  { %v1901_v44 = vrot.slane %v1900_v16, 2  ;;  %v1848_v28 = vadd.f32 %v1847_v43, %v1846_v1  ;;  %v3059_v1 = vld [vmem:[%s3199_s8] ss:$0 sm:$0xff]  ;;  %v3061_v43 = vpop.f32.mrf.mxu0  ;;  %s3069_s8 = spop %2246 }
 0x242   :  { %v3041_v47 = vpop.f32.mrf.mxu3  ;;  %2248 = vpush %v1848_v28  ;;  %v1902_v48 = vadd.f32 %v1901_v44, %v1900_v16 }
 0x244   :  { %v1903_v49 = vrot.slane %v1902_v48, 1 }
 0x246   :  { %v1904_v51 = vadd.f32 %v1903_v49, %v1902_v48 }
 0x248   :  { %2250 = vpush %v1904_v51 }
 0x24a   :  { %v3043_v54 = vpop.f32.mrf.mxu3 }
 0x252   :  { %v1010_v55 = vpop.f32.mrf.mxu3 }
 0x253   :  { %v1011_v12 = vadd.f32 %v1010_v55, %v885_v58  ;;  %v1907_v58 = vshrl.u32 %v58_v62, 7 }
 0x255   :  { %v1179_v61 = vadd.f32 %v1139_v20, %v1011_v12  ;;  %vm1909_vm1 = vcmp.eq.s32.totalorder %v1907_v58, 1  ;;  %vm1910_vm3 = vcmp.eq.s32.totalorder %v1907_v58, 2  ;;  %vm1908_vm0 = vcmp.eq.s32.totalorder %v1907_v58, 0 }
 0x257   :  { %v1199_v30 = vadd.f32 %v3048_v38, %v1179_v61 }
 0x259   :  { %v2190_v46 = vmul.f32 -1.442695, %v1199_v30 }
 0x25a   :  { %v1012_v2 = vpop.f32.mrf.mxu3 }
 0x25b   :  { %2261 = vpow2.f32 %v2190_v46  ;;  %v1013_v3 = vadd.f32 %v1012_v2, %v887_v0 }
 0x25d   :  { %v1180_v59 = vadd.f32 %v1141_v27, %v1013_v3 }
 0x25f   :  { %v1200_v32 = vadd.f32 %v3048_v38, %v1180_v59 }
 0x261   :  { %v2262_v36 = vpop.eup %2261  ;;  %v2191_v34 = vmul.f32 -1.442695, %v1200_v32 }
 0x262   :  { %v1263_v6 = vadd.f32 1.0, %v2262_v36  ;;  %v1015_v11 = vpop.f32.mrf.mxu3 }
 0x263   :  { %2263 = vpow2.f32 %v2191_v34  ;;  %v1016_v13 = vadd.f32 %v1015_v11, %v890_v5 }
 0x264   :  { %2265 = vrcp.f32 %v1263_v6  ;;  %v1288_v10 = vand.u32 2147483647, %v1263_v6  ;;  %v1290_v20 = vand.u32 2147483648, %v1263_v6  ;;  %vm1284_vm11 = vweird.f32 %v1263_v6 }
 0x265   :  { %v1181_v14 = vadd.f32 %v1144_v52, %v1016_v13 }
 0x266   :  { %vm1289_vm8 = vcmp.eq.f32.partialorder %v1288_v10, 8.507059e+37  ;;  %v1291_v28 = vor.u32 1.1754944e-38, %v1290_v20 }
 0x267   :  { %v1201_v15 = vadd.f32 %v3048_v38, %v1181_v14  ;;  %v1156_v14 = vpop.f32.mrf.mxu0 }
 0x269   :  { %v2264_v35 = vpop.eup %2263  ;;  %v2192_v17 = vmul.f32 -1.442695, %v1201_v15 }
 0x26a   :  { %v2266_v18 = vpop.eup %2265  ;;  %v1264_v41 = vadd.f32 1.0, %v2264_v35  ;;  %v1017_v63 = vpop.f32.mrf.mxu3 }
 0x26b   :  { %2267 = vpow2.f32 %v2192_v17  ;;  %v1018_v23 = vadd.f32 %v1017_v63, %v892_v56  ;;  %v1280_v45 = vmul.f32 %v2266_v18, %v1263_v6  ;;  %vm1285_vm10 = vweird.f32 %v2266_v18 }
 0x26c   :  { %2269 = vrcp.f32 %v1264_v41  ;;  %vm1286_vm12 = vmor %vm1284_vm11, %vm1285_vm10  ;;  %v1303_v61 = vand.u32 2147483647, %v1264_v41  ;;  %v1305_v0 = vand.u32 2147483648, %v1264_v41  ;;  %vm1299_vm5 = vweird.f32 %v1264_v41 }
 0x26d   :  { %v1182_v39 = vadd.f32 %v1146_v57, %v1018_v23  ;;  %v1281_v22 = vsub.f32 1.0, %v1280_v45 }
 0x26e   :  { %vm1304_vm4 = vcmp.eq.f32.partialorder %v1303_v61, 8.507059e+37  ;;  %v1306_v34 = vor.u32 1.1754944e-38, %v1305_v0 }
 0x26f   :  { %v1202_v37 = vadd.f32 %v3048_v38, %v1182_v39  ;;  %v1282_v7 = vmul.f32 %v2266_v18, %v1281_v22 }
 0x271   :  { %v2268_v60 = vpop.eup %2267  ;;  %v2193_v40 = vmul.f32 -1.442695, %v1202_v37  ;;  %v1283_v8 = vadd.f32 %v2266_v18, %v1282_v7 }
 0x272   :  { %v2270_v16 = vpop.eup %2269  ;;  %v3063_v27 = vadd.f32 1.0, %v2268_v60  ;;  %v1020_v44 = vpop.f32.mrf.mxu3 }
 0x273   :  { %2271 = vpow2.f32 %v2193_v40  ;;  %v1021_v48 = vadd.f32 %v1020_v44, %v3011_v53  ;;  %v1287_v49 = vsel %vm1286_vm12, %v2266_v18, %v1283_v8  ;;  %v1295_v51 = vmul.f32 %v2270_v16, %v1264_v41  ;;  %s2249_s22 = spop %2248 }
 0x274   :  { %2273 = vrcp.f32 %v3063_v27  ;;  %v1292_v52 = vsel %vm1289_vm8, %v1291_v28, %v1287_v49  ;;  %vm1300_vm2 = vweird.f32 %v2270_v16  ;;  %v1913_v32 = vstv %s2249_s22 }
 0x275   :  { %v1183_v55 = vadd.f32 %v1149_v50, %v1021_v48  ;;  %v1523_v12 = vmul.f32 %v3059_v1, %v1292_v52  ;;  %v1296_v57 = vsub.f32 1.0, %v1295_v51  ;;  %vm1301_vm6 = vmor %vm1299_vm5, %vm1300_vm2  ;;  %v1915_v18 = vstv %s3069_s8  ;;  %v1159_v52 = vpop.f32.mrf.mxu0 }
 0x276   :  { %v1320_v39 = vand.u32 2147483648, %v3063_v27  ;;  %v1318_v10 = vand.u32 2147483647, %v3063_v27  ;;  %vm1314_vm9 = vweird.f32 %v3063_v27 }
 0x277   :  { %v1203_v30 = vadd.f32 %v3048_v38, %v1183_v55  ;;  %v1540_v53 = vsel %vm1539_vm15, %v1523_v12, 0.0  ;;  %v1297_v46 = vmul.f32 %v2270_v16, %v1296_v57 }
 0x278   :  { %1541 = vadd.xlane.f32.xlu2 %v1540_v53  ;;  %vm1319_vm13 = vcmp.eq.f32.partialorder %v1318_v10, 8.507059e+37 }
 0x279   :  { %v2272_v62 = vpop.eup %2271  ;;  %v2194_v2 = vmul.f32 -1.442695, %v1203_v30  ;;  %s2251_s23 = spop %2250  ;;  %v1298_v3 = vadd.f32 %v2270_v16, %v1297_v46 }
 0x27a   :  { %v2274_v59 = vpop.eup %2273  ;;  %v3073_v50 = vadd.f32 1.0, %v2272_v62  ;;  %v1911_v5 = vstv %s2251_s23  ;;  %v1022_v36 = vpop.f32.mrf.mxu3 }
 0x27b   :  { %2275 = vpow2.f32 %v2194_v2  ;;  %v1912_v6 = vsel %vm1910_vm3, %v1911_v5, 0.0  ;;  %v1023_v11 = vadd.f32 %v1022_v36, %v3013_v19  ;;  %v1302_v13 = vsel %vm1301_vm6, %v2270_v16, %v1298_v3 }
 0x27c   :  { %2277 = vrcp.f32 %v3073_v50  ;;  %v1914_v15 = vsel %vm1909_vm1, %v1913_v32, %v1912_v6  ;;  %v1307_v35 = vsel %vm1304_vm4, %v1306_v34, %v1302_v13  ;;  %v1310_v17 = vmul.f32 %v2274_v59, %v3063_v27 }
 0x27d   :  { %v1184_v56 = vadd.f32 %v3053_v33, %v1023_v11  ;;  %v1524_v41 = vmul.f32 %v3059_v1, %v1307_v35  ;;  %v1916_v23 = vsel %vm1908_vm0, %v1915_v18, %v1914_v15  ;;  %vm1315_vm14 = vweird.f32 %v2274_v59  ;;  %v1161_v35 = vpop.f32.mrf.mxu0 }
 0x27e   :  { %v1311_v63 = vsub.f32 1.0, %v1310_v17  ;;  %1917 = vst [vmem:[#allocation5] sm:$0xff] %v1916_v23  ;;  %vm1316_vm7 = vmor %vm1314_vm9, %vm1315_vm14  ;;  %v1321_v16 = vor.u32 1.1754944e-38, %v1320_v39  ;;  %v1333_v55 = vand.u32 2147483647, %v3073_v50  ;;  %v1335_v27 = vand.u32 2147483648, %v3073_v50 }
 0x27f   :  { %v1204_v45 = vadd.f32 %v3048_v38, %v1184_v56  ;;  %v1543_v19 = vsel %vm1539_vm15, %v1524_v41, 0.0  ;;  %vm1329_vm11 = vweird.f32 %v3073_v50  ;;  %1939 = dma.vmem_to_hbm [thread:$0]  %s1935_s9, 128, %s1937_s27, [#allocation6]  }
 0x280   :  { %1544 = vadd.xlane.f32.xlu0 %v1543_v19  ;;  %v1312_v22 = vmul.f32 %v2274_v59, %v1311_v63  ;;  %vm1334_vm8 = vcmp.eq.f32.partialorder %v1333_v55, 8.507059e+37  ;;  %v1336_v62 = vor.u32 1.1754944e-38, %v1335_v27 }
 0x281   :  { %v2276_v20 = vpop.eup %2275  ;;  %v2195_v37 = vmul.f32 -1.442695, %v1204_v45 }
 0x282   :  { %v2278_v33 = vpop.eup %2277  ;;  %v1267_v7 = vadd.f32 1.0, %v2276_v20  ;;  %v1025_v60 = vpop.f32.mrf.mxu3  ;;  %v1313_v40 = vadd.f32 %v2274_v59, %v1312_v22 }
 0x283   :  { %2279 = vpow2.f32 %v2195_v37  ;;  %v1026_v8 = vadd.f32 %v1025_v60, %v3017_v26  ;;  %v1325_v44 = vmul.f32 %v2278_v33, %v3073_v50  ;;  %vm1330_vm10 = vweird.f32 %v2278_v33 }
 0x284   :  { %2281 = vrcp.f32 %v1267_v7  ;;  %v1317_v28 = vsel %vm1316_vm7, %v2274_v59, %v1313_v40  ;;  %vm1331_vm12 = vmor %vm1329_vm11, %vm1330_vm10  ;;  %v1348_v6 = vand.u32 2147483647, %v1267_v7  ;;  %v1350_v11 = vand.u32 2147483648, %v1267_v7 }
 0x285   :  { %v1185_v48 = vadd.f32 %v3061_v43, %v1026_v8  ;;  %v1322_v49 = vsel %vm1319_vm13, %v1321_v16, %v1317_v28  ;;  %v1326_v51 = vsub.f32 1.0, %v1325_v44  ;;  %vm1344_vm1 = vweird.f32 %v1267_v7  ;;  %v1164_v28 = vpop.f32.mrf.mxu0 }
 0x286   :  { %v1525_v58 = vmul.f32 %v3059_v1, %v1322_v49  ;;  %vm1349_vm0 = vcmp.eq.f32.partialorder %v1348_v6, 8.507059e+37  ;;  %v1351_v63 = vor.u32 1.1754944e-38, %v1350_v11 }
 0x287   :  { %v1205_v26 = vadd.f32 %v3048_v38, %v1185_v48  ;;  %v1327_v12 = vmul.f32 %v2278_v33, %v1326_v51 }
 0x288   :  { %v1546_v57 = vsel %vm1539_vm15, %v1525_v58, 0.0 }
 0x289   :  { %v2280_v61 = vpop.eup %2279  ;;  %v2196_v0 = vmul.f32 -1.442695, %v1205_v26  ;;  %1547 = vadd.xlane.f32.xlu1 %v1546_v57  ;;  %v1328_v30 = vadd.f32 %v2278_v33, %v1327_v12 }
 0x28a   :  { %v2282_v43 = vpop.eup %2281  ;;  %v1268_v53 = vadd.f32 1.0, %v2280_v61  ;;  %v1027_v46 = vpop.f32.mrf.mxu3 }
 0x28b   :  { %2283 = vpow2.f32 %v2196_v0  ;;  %v1028_v2 = vadd.f32 %v1027_v46, %v3019_v25  ;;  %v1332_v3 = vsel %vm1331_vm12, %v2278_v33, %v1328_v30  ;;  %v1340_v59 = vmul.f32 %v2282_v43, %v1267_v7 }
 0x28c   :  { %2285 = vrcp.f32 %v1268_v53  ;;  %v1337_v32 = vsel %vm1334_vm8, %v1336_v62, %v1332_v3  ;;  %vm1345_vm2 = vweird.f32 %v2282_v43  ;;  %v1363_v37 = vand.u32 2147483647, %v1268_v53 }
 0x28d   :  { %v1186_v5 = vadd.f32 %v1156_v14, %v1028_v2  ;;  %v1526_v36 = vmul.f32 %v3059_v1, %v1337_v32  ;;  %v1341_v34 = vsub.f32 1.0, %v1340_v59  ;;  %vm1346_vm3 = vmor %vm1344_vm1, %vm1345_vm2  ;;  %v1365_v33 = vand.u32 2147483648, %v1268_v53  ;;  %v1166_v6 = vpop.f32.mrf.mxu0 }
 0x28e   :  { %vm1359_vm4 = vweird.f32 %v1268_v53  ;;  %vm1364_vm14 = vcmp.eq.f32.partialorder %v1363_v37, 8.507059e+37 }
 0x28f   :  { %v1206_v50 = vadd.f32 %v3048_v38, %v1186_v5  ;;  %v1549_v13 = vsel %vm1539_vm15, %v1526_v36, 0.0  ;;  %v1342_v15 = vmul.f32 %v2282_v43, %v1341_v34  ;;  %v1366_v51 = vor.u32 1.1754944e-38, %v1365_v33 }
 0x290   :  { %1550 = vadd.xlane.f32.xlu2 %v1549_v13 }
 0x291   :  { %v2284_v17 = vpop.eup %2283  ;;  %v2197_v25 = vmul.f32 -1.442695, %v1206_v50  ;;  %v1343_v18 = vadd.f32 %v2282_v43, %v1342_v15 }
 0x292   :  { %v2286_v56 = vpop.eup %2285  ;;  %v1269_v41 = vadd.f32 1.0, %v2284_v17  ;;  %v1030_v14 = vpop.f32.mrf.mxu3 }
 0x293   :  { %2287 = vpow2.f32 %v2197_v25  ;;  %v1031_v23 = vadd.f32 %v1030_v14, %v3023_v21  ;;  %v1347_v45 = vsel %vm1346_vm3, %v2282_v43, %v1343_v18  ;;  %v1355_v19 = vmul.f32 %v2286_v56, %v1268_v53 }
 0x294   :  { %2289 = vrcp.f32 %v1269_v41  ;;  %v1352_v39 = vsel %vm1349_vm0, %v1351_v63, %v1347_v45  ;;  %vm1360_vm5 = vweird.f32 %v2286_v56  ;;  %v1378_v61 = vand.u32 2147483647, %v1269_v41 }
 0x295   :  { %v1187_v22 = vadd.f32 %v1159_v52, %v1031_v23  ;;  %v1527_v10 = vmul.f32 %v3059_v1, %v1352_v39  ;;  %v1356_v20 = vsub.f32 1.0, %v1355_v19  ;;  %vm1361_vm6 = vmor %vm1359_vm4, %vm1360_vm5  ;;  %v1380_v0 = vand.u32 2147483648, %v1269_v41 }
 0x296   :  { %vm1374_vm7 = vweird.f32 %v1269_v41  ;;  %vm1379_vm10 = vcmp.eq.f32.partialorder %v1378_v61, 8.507059e+37 }
 0x297   :  { %v1207_v7 = vadd.f32 %v3048_v38, %v1187_v22  ;;  %v1552_v60 = vsel %vm1539_vm15, %v1527_v10, 0.0  ;;  %v1357_v40 = vmul.f32 %v2286_v56, %v1356_v20  ;;  %v1381_v32 = vor.u32 1.1754944e-38, %v1380_v0 }
 0x298   :  { %1553 = vadd.xlane.f32.xlu1 %v1552_v60  ;;  %v1169_v60 = vpop.f32.mrf.mxu0 }
 0x299   :  { %v2288_v8 = vpop.eup %2287  ;;  %v2198_v16 = vmul.f32 -1.442695, %v1207_v7  ;;  %v1358_v21 = vadd.f32 %v2286_v56, %v1357_v40 }
 0x29a   :  { %v2290_v44 = vpop.eup %2289  ;;  %v1270_v48 = vadd.f32 1.0, %v2288_v8  ;;  %v1032_v49 = vpop.f32.mrf.mxu3 }
 0x29b   :  { %2291 = vpow2.f32 %v2198_v16  ;;  %v1033_v52 = vadd.f32 %v1032_v49, %v3025_v29  ;;  %v1362_v58 = vsel %vm1361_vm6, %v2286_v56, %v1358_v21  ;;  %v1370_v55 = vmul.f32 %v2290_v44, %v1269_v41 }
 0x29c   :  { %2293 = vrcp.f32 %v1270_v48  ;;  %v1367_v27 = vsel %vm1364_vm14, %v1366_v51, %v1362_v58  ;;  %vm1375_vm9 = vweird.f32 %v2290_v44  ;;  %v1395_v17 = vand.u32 2147483648, %v1270_v48 }
 0x29d   :  { %v1188_v26 = vadd.f32 %v1161_v35, %v1033_v52  ;;  %v1528_v12 = vmul.f32 %v3059_v1, %v1367_v27  ;;  %v1371_v57 = vsub.f32 1.0, %v1370_v55  ;;  %vm1376_vm13 = vmor %vm1374_vm7, %vm1375_vm9  ;;  %v1393_v35 = vand.u32 2147483647, %v1270_v48 }
 0x29e   :  { %vm1389_vm12 = vweird.f32 %v1270_v48  ;;  %v1396_v19 = vor.u32 1.1754944e-38, %v1395_v17 }
 0x29f   :  { %v1208_v30 = vadd.f32 %v3048_v38, %v1188_v26  ;;  %v1555_v43 = vsel %vm1539_vm15, %v1528_v12, 0.0  ;;  %v1372_v53 = vmul.f32 %v2290_v44, %v1371_v57  ;;  %vm1394_vm2 = vcmp.eq.f32.partialorder %v1393_v35, 8.507059e+37 }
 0x2a0   :  { %1556 = vadd.xlane.f32.xlu2 %v1555_v43 }
 0x2a1   :  { %v2292_v46 = vpop.eup %2291  ;;  %v2199_v62 = vmul.f32 -1.442695, %v1208_v30  ;;  %v1373_v29 = vadd.f32 %v2290_v44, %v1372_v53 }
 0x2a2   :  { %v2294_v2 = vpop.eup %2293  ;;  %v1271_v3 = vadd.f32 1.0, %v2292_v46  ;;  %v1035_v59 = vpop.f32.mrf.mxu3 }
 0x2a3   :  { %2295 = vpow2.f32 %v2199_v62  ;;  %v1036_v5 = vadd.f32 %v1035_v59, %v3029_v24  ;;  %v1377_v36 = vsel %vm1376_vm13, %v2290_v44, %v1373_v29  ;;  %v1385_v34 = vmul.f32 %v2294_v2, %v1270_v48  ;;  %v1171_v29 = vpop.f32.mrf.mxu0 }
 0x2a4   :  { %2297 = vrcp.f32 %v1271_v3  ;;  %v1382_v11 = vsel %vm1379_vm10, %v1381_v32, %v1377_v36  ;;  %vm1390_vm11 = vweird.f32 %v2294_v2  ;;  %v1408_v40 = vand.u32 2147483647, %v1271_v3 }
 0x2a5   :  { %v1189_v50 = vadd.f32 %v1164_v28, %v1036_v5  ;;  %v1529_v13 = vmul.f32 %v3059_v1, %v1382_v11  ;;  %v1386_v15 = vsub.f32 1.0, %v1385_v34  ;;  %vm1391_vm8 = vmor %vm1389_vm12, %vm1390_vm11  ;;  %v1410_v8 = vand.u32 2147483648, %v1271_v3 }
 0x2a6   :  { %vm1404_vm3 = vweird.f32 %v1271_v3  ;;  %vm1409_vm5 = vcmp.eq.f32.partialorder %v1408_v40, 8.507059e+37 }
 0x2a7   :  { %v1209_v25 = vadd.f32 %v3048_v38, %v1189_v50  ;;  %v1558_v18 = vsel %vm1539_vm15, %v1529_v13, 0.0  ;;  %v1387_v56 = vmul.f32 %v2294_v2, %v1386_v15  ;;  %v1411_v58 = vor.u32 1.1754944e-38, %v1410_v8 }
 0x2a8   :  { %1559 = vadd.xlane.f32.xlu1 %v1558_v18 }
 0x2a9   :  { %v2296_v41 = vpop.eup %2295  ;;  %v2200_v24 = vmul.f32 -1.442695, %v1209_v25  ;;  %v1388_v14 = vadd.f32 %v2294_v2, %v1387_v56 }
 0x2aa   :  { %v2298_v63 = vpop.eup %2297  ;;  %v1272_v23 = vadd.f32 1.0, %v2296_v41  ;;  %v1037_v45 = vpop.f32.mrf.mxu3 }
 0x2ab   :  { %2299 = vpow2.f32 %v2200_v24  ;;  %v1038_v39 = vadd.f32 %v1037_v45, %v3031_v31  ;;  %v1392_v22 = vsel %vm1391_vm8, %v2294_v2, %v1388_v14  ;;  %v1400_v10 = vmul.f32 %v2298_v63, %v1271_v3 }
 0x2ac   :  { %2301 = vrcp.f32 %v1272_v23  ;;  %v1397_v20 = vsel %vm1394_vm2, %v1396_v19, %v1392_v22  ;;  %vm1405_vm1 = vweird.f32 %v2298_v63  ;;  %v1423_v30 = vand.u32 2147483647, %v1272_v23 }
 0x2ad   :  { %v1190_v37 = vadd.f32 %v1166_v6, %v1038_v39  ;;  %v1530_v33 = vmul.f32 %v3059_v1, %v1397_v20  ;;  %v1401_v7 = vsub.f32 1.0, %v1400_v10  ;;  %vm1406_vm0 = vmor %vm1404_vm3, %vm1405_vm1  ;;  %v1425_v43 = vand.u32 2147483648, %v1272_v23 }
 0x2ae   :  { %vm1419_vm6 = vweird.f32 %v1272_v23  ;;  %vm1424_vm9 = vcmp.eq.f32.partialorder %v1423_v30, 8.507059e+37 }
 0x2af   :  { %v1210_v16 = vadd.f32 %v3048_v38, %v1190_v37  ;;  %v1561_v21 = vsel %vm1539_vm15, %v1530_v33, 0.0  ;;  %v1402_v44 = vmul.f32 %v2298_v63, %v1401_v7  ;;  %v1426_v36 = vor.u32 1.1754944e-38, %v1425_v43 }
 0x2b0   :  { %1562 = vadd.xlane.f32.xlu2 %v1561_v21 }
 0x2b1   :  { %v2300_v28 = vpop.eup %2299  ;;  %v2201_v31 = vmul.f32 -1.442695, %v1210_v16  ;;  %v1403_v48 = vadd.f32 %v2298_v63, %v1402_v44 }
 0x2b2   :  { %v2302_v49 = vpop.eup %2301  ;;  %v1273_v51 = vadd.f32 1.0, %v2300_v28  ;;  %v1040_v52 = vpop.f32.mrf.mxu3 }
 0x2b3   :  { %2303 = vpow2.f32 %v2201_v31  ;;  %v1041_v55 = vadd.f32 %v1040_v52, %v3035_v9  ;;  %v1407_v27 = vsel %vm1406_vm0, %v2298_v63, %v1403_v48  ;;  %v1415_v26 = vmul.f32 %v2302_v49, %v1272_v23  ;;  %v1174_v23 = vpop.f32.mrf.mxu0 }
 0x2b4   :  { %2305 = vrcp.f32 %v1273_v51  ;;  %v1412_v12 = vsel %vm1409_vm5, %v1411_v58, %v1407_v27  ;;  %vm1420_vm4 = vweird.f32 %v2302_v49  ;;  %v1438_v17 = vand.u32 2147483647, %v1273_v51 }
 0x2b5   :  { %v1191_v57 = vadd.f32 %v1169_v60, %v1041_v55  ;;  %v1531_v61 = vmul.f32 %v3059_v1, %v1412_v12  ;;  %v1416_v0 = vsub.f32 1.0, %v1415_v26  ;;  %vm1421_vm14 = vmor %vm1419_vm6, %vm1420_vm4  ;;  %v1440_v25 = vand.u32 2147483648, %v1273_v51 }
 0x2b6   :  { %vm1434_vm13 = vweird.f32 %v1273_v51  ;;  %vm1439_vm11 = vcmp.eq.f32.partialorder %v1438_v17, 8.507059e+37 }
 0x2b7   :  { %v1211_v53 = vadd.f32 %v3048_v38, %v1191_v57  ;;  %v1564_v46 = vsel %vm1539_vm15, %v1531_v61, 0.0  ;;  %v1417_v62 = vmul.f32 %v2302_v49, %v1416_v0  ;;  %v1441_v39 = vor.u32 1.1754944e-38, %v1440_v25 }
 0x2b8   :  { %1565 = vadd.xlane.f32.xlu1 %v1564_v46 }
 0x2b9   :  { %v2304_v2 = vpop.eup %2303  ;;  %v2202_v9 = vmul.f32 -1.442695, %v1211_v53  ;;  %v1418_v3 = vadd.f32 %v2302_v49, %v1417_v62 }
 0x2ba   :  { %v2306_v59 = vpop.eup %2305  ;;  %v1274_v32 = vadd.f32 1.0, %v2304_v2  ;;  %v1042_v5 = vpop.f32.mrf.mxu3 }
 0x2bb   :  { %2307 = vpow2.f32 %v2202_v9  ;;  %v1043_v34 = vadd.f32 %v1042_v5, %v3037_v42  ;;  %v1422_v6 = vsel %vm1421_vm14, %v2302_v49, %v1418_v3  ;;  %v1430_v11 = vmul.f32 %v2306_v59, %v1273_v51  ;;  %v1176_v26 = vpop.f32.mrf.mxu0 }
 0x2bc   :  { %2309 = vrcp.f32 %v1274_v32  ;;  %v1427_v50 = vsel %vm1424_vm9, %v1426_v36, %v1422_v6  ;;  %vm1435_vm7 = vweird.f32 %v2306_v59  ;;  %v1453_v40 = vand.u32 2147483647, %v1274_v32 }
 0x2bd   :  { %v1192_v13 = vadd.f32 %v1171_v29, %v1043_v34  ;;  %v1532_v15 = vmul.f32 %v3059_v1, %v1427_v50  ;;  %v1431_v35 = vsub.f32 1.0, %v1430_v11  ;;  %vm1436_vm10 = vmor %vm1434_vm13, %vm1435_vm7  ;;  %v1455_v8 = vand.u32 2147483648, %v1274_v32 }
 0x2be   :  { %vm1449_vm8 = vweird.f32 %v1274_v32  ;;  %vm1454_vm1 = vcmp.eq.f32.partialorder %v1453_v40, 8.507059e+37 }
 0x2bf   :  { %v1212_v18 = vadd.f32 %v3048_v38, %v1192_v13  ;;  %v1567_v56 = vsel %vm1539_vm15, %v1532_v15, 0.0  ;;  %v1432_v41 = vmul.f32 %v2306_v59, %v1431_v35  ;;  %v1456_v52 = vor.u32 1.1754944e-38, %v1455_v8 }
 0x2c0   :  { %1568 = vadd.xlane.f32.xlu0 %v1567_v56 }
 0x2c1   :  { %v2308_v24 = vpop.eup %2307  ;;  %v2203_v14 = vmul.f32 -1.442695, %v1212_v18  ;;  %v1433_v42 = vadd.f32 %v2306_v59, %v1432_v41 }
 0x2c2   :  { %v2310_v63 = vpop.eup %2309  ;;  %v1275_v45 = vadd.f32 1.0, %v2308_v24  ;;  %v1045_v19 = vpop.f32.mrf.mxu3 }
 0x2c3   :  { %2311 = vpow2.f32 %v2203_v14  ;;  %v1046_v22 = vadd.f32 %v1045_v19, %v3041_v47  ;;  %v1437_v10 = vsel %vm1436_vm10, %v2306_v59, %v1433_v42  ;;  %v1445_v20 = vmul.f32 %v2310_v63, %v1274_v32 }
 0x2c4   :  { %2313 = vrcp.f32 %v1275_v45  ;;  %v1442_v37 = vsel %vm1439_vm11, %v1441_v39, %v1437_v10  ;;  %vm1450_vm12 = vweird.f32 %v2310_v63  ;;  %v1468_v30 = vand.u32 2147483647, %v1275_v45 }
 0x2c5   :  { %v1193_v33 = vadd.f32 %v1174_v23, %v1046_v22  ;;  %v1533_v7 = vmul.f32 %v3059_v1, %v1442_v37  ;;  %v1446_v60 = vsub.f32 1.0, %v1445_v20  ;;  %vm1451_vm2 = vmor %vm1449_vm8, %vm1450_vm12  ;;  %v1470_v43 = vand.u32 2147483648, %v1275_v45 }
 0x2c6   :  { %vm1464_vm0 = vweird.f32 %v1275_v45  ;;  %vm1469_vm4 = vcmp.eq.f32.partialorder %v1468_v30, 8.507059e+37 }
 0x2c7   :  { %v1213_v16 = vadd.f32 %v3048_v38, %v1193_v33  ;;  %v1570_v21 = vsel %vm1539_vm15, %v1533_v7, 0.0  ;;  %v1447_v44 = vmul.f32 %v2310_v63, %v1446_v60  ;;  %v1471_v59 = vor.u32 1.1754944e-38, %v1470_v43 }
 0x2c8   :  { %1571 = vadd.xlane.f32.xlu2 %v1570_v21 }
 0x2c9   :  { %v2312_v28 = vpop.eup %2311  ;;  %v2204_v31 = vmul.f32 -1.442695, %v1213_v16  ;;  %v1448_v47 = vadd.f32 %v2310_v63, %v1447_v44 }
 0x2ca   :  { %v2314_v48 = vpop.eup %2313  ;;  %v1276_v49 = vadd.f32 1.0, %v2312_v28  ;;  %v1047_v51 = vpop.f32.mrf.mxu3 }
 0x2cb   :  { %2315 = vpow2.f32 %v2204_v31  ;;  %v1048_v58 = vadd.f32 %v1047_v51, %v3043_v54  ;;  %v1452_v55 = vsel %vm1451_vm2, %v2310_v63, %v1448_v47  ;;  %v1460_v27 = vmul.f32 %v2314_v48, %v1275_v45 }
 0x2cc   :  { %2317 = vrcp.f32 %v1276_v49  ;;  %v1457_v12 = vsel %vm1454_vm1, %v1456_v52, %v1452_v55  ;;  %vm1465_vm3 = vweird.f32 %v2314_v48  ;;  %v1485_v6 = vand.u32 2147483648, %v1276_v49 }
 0x2cd   :  { %v1194_v57 = vadd.f32 %v1176_v26, %v1048_v58  ;;  %v1534_v61 = vmul.f32 %v3059_v1, %v1457_v12  ;;  %v1461_v0 = vsub.f32 1.0, %v1460_v27  ;;  %vm1466_vm5 = vmor %vm1464_vm0, %vm1465_vm3  ;;  %v1483_v13 = vand.u32 2147483647, %v1276_v49  ;;  %v1592_v12 = vpop.permute.xlu0 %1591 }
 0x2ce   :  { %vm1479_vm14 = vweird.f32 %v1276_v49  ;;  %v1486_v18 = vor.u32 1.1754944e-38, %v1485_v6  ;;  %v3146_v43 = vperm.slane %v1592_v12, 0  ;;  %vm1634_vm0 = vcmask 195712  }
 0x2cf   :  { %v1214_v53 = vadd.f32 %v3048_v38, %v1194_v57  ;;  %v1573_v46 = vsel %vm1539_vm15, %v1534_v61, 0.0  ;;  %v1462_v62 = vmul.f32 %v2314_v48, %v1461_v0  ;;  %vm1484_vm7 = vcmp.eq.f32.partialorder %v1483_v13, 8.507059e+37 }
 0x2d0   :  { %1574 = vadd.xlane.f32.xlu1 %v1573_v46  ;;  %v1644_v6 = vadd.s32 4294967256, %v2631_v4  ;;  %v1648_v13 = vadd.s32 4294967248, %v2631_v4  ;;  %v1684_v12 = vadd.s32 4294967176, %v2631_v4 }
 0x2d1   :  { %v2316_v29 = vpop.eup %2315  ;;  %v2205_v54 = vmul.f32 -1.442695, %v1214_v53  ;;  %v1463_v2 = vadd.f32 %v2314_v48, %v1462_v62  ;;  %v1632_v62 = vadd.s32 4294967280, %v2631_v4 }
 0x2d2   :  { %v2318_v9 = vpop.eup %2317  ;;  %v1277_v3 = vadd.f32 1.0, %v2316_v29 }
 0x2d3   :  { %2319 = vpow2.f32 %v2205_v54  ;;  %v1467_v32 = vsel %vm1466_vm5, %v2314_v48, %v1463_v2  ;;  %v1475_v5 = vmul.f32 %v2318_v9, %v1276_v49  ;;  %vm1480_vm6 = vweird.f32 %v2318_v9 }
 0x2d4   :  { %2321 = vrcp.f32 %v1277_v3  ;;  %v1472_v36 = vsel %vm1469_vm4, %v1471_v59, %v1467_v32  ;;  %vm1481_vm9 = vmor %vm1479_vm14, %vm1480_vm6  ;;  %v1500_v63 = vand.u32 2147483648, %v1277_v3  ;;  %v1498_v19 = vand.u32 2147483647, %v1277_v3 }
 0x2d5   :  { %v1535_v38 = vmul.f32 %v3059_v1, %v1472_v36  ;;  %v1476_v34 = vsub.f32 1.0, %v1475_v5  ;;  %vm1494_vm10 = vweird.f32 %v1277_v3  ;;  %v1636_v54 = vadd.s32 4294967272, %v2631_v4 }
 0x2d6   :  { %v1501_v10 = vor.u32 1.1754944e-38, %v1500_v63  ;;  %vm1499_vm12 = vcmp.eq.f32.partialorder %v1498_v19, 8.507059e+37  ;;  %v1640_v59 = vadd.s32 4294967264, %v2631_v4  ;;  %vm1638_vm5 = vcmask 261312  }
 0x2d7   :  { %v1576_v11 = vsel %vm1539_vm15, %v1535_v38, 0.0  ;;  %v1477_v50 = vmul.f32 %v2318_v9, %v1476_v34  ;;  %vm1642_vm4 = vcmask 326912   ;;  %vm1646_vm6 = vcmask 392512  }
 0x2d8   :  { %1577 = vadd.xlane.f32.xlu2 %v1576_v11  ;;  %vm1650_vm14 = vcmask 458112   ;;  %v1660_v63 = vadd.s32 4294967224, %v2631_v4  ;;  %v1664_v19 = vadd.s32 4294967216, %v2631_v4 }
 0x2d9   :  { %v2320_v15 = vpop.eup %2319  ;;  %v1478_v35 = vadd.f32 %v2318_v9, %v1477_v50 }
 0x2da   :  { %v2322_v17 = vpop.eup %2321  ;;  %v1278_v25 = vadd.f32 1.0, %v2320_v15 }
 0x2db   :  { %v1482_v56 = vsel %vm1481_vm9, %v2318_v9, %v1478_v35  ;;  %v1490_v41 = vmul.f32 %v2322_v17, %v1277_v3  ;;  %vm1495_vm13 = vweird.f32 %v2322_v17  ;;  %vm1654_vm9 = vcmask 523712  }
 0x2dc   :  { %2323 = vrcp.f32 %v1278_v25  ;;  %v1487_v24 = vsel %vm1484_vm7, %v1486_v18, %v1482_v56  ;;  %vm1496_vm11 = vmor %vm1494_vm10, %vm1495_vm13  ;;  %v1515_v40 = vand.u32 2147483648, %v1278_v25  ;;  %v1513_v21 = vand.u32 2147483647, %v1278_v25 }
 0x2dd   :  { %v1536_v14 = vmul.f32 %v3059_v1, %v1487_v24  ;;  %v1491_v42 = vsub.f32 1.0, %v1490_v41  ;;  %vm1509_vm2 = vweird.f32 %v1278_v25  ;;  %v1656_v41 = vadd.s32 4294967232, %v2631_v4 }
 0x2de   :  { %v1516_v28 = vor.u32 1.1754944e-38, %v1515_v40  ;;  %vm1514_vm3 = vcmp.eq.f32.partialorder %v1513_v21, 8.507059e+37  ;;  %vm1658_vm7 = vcmask 589312   ;;  %vm1662_vm13 = vcmask 654912  }
 0x2df   :  { %v1579_v23 = vsel %vm1539_vm15, %v1536_v14, 0.0  ;;  %v1492_v45 = vmul.f32 %v2322_v17, %v1491_v42  ;;  %v1672_v40 = vadd.s32 4294967200, %v2631_v4  ;;  %vm1666_vm10 = vcmask 720512  }
 0x2e0   :  { %1580 = vadd.xlane.f32.xlu1 %v1579_v23 }
 0x2e1   :  { %v1493_v39 = vadd.f32 %v2322_v17, %v1492_v45 }
 0x2e2   :  { %v2324_v22 = vpop.eup %2323 }
 0x2e3   :  { %v1497_v20 = vsel %vm1496_vm11, %v2322_v17, %v1493_v39  ;;  %v1505_v37 = vmul.f32 %v2324_v22, %v1278_v25  ;;  %vm1510_vm8 = vweird.f32 %v2324_v22  ;;  %v1652_v25 = vadd.s32 4294967240, %v2631_v4 }
 0x2e4   :  { %v1502_v33 = vsel %vm1499_vm12, %v1501_v10, %v1497_v20  ;;  %vm1511_vm1 = vmor %vm1509_vm2, %vm1510_vm8  ;;  %vm1670_vm11 = vcmask 786112   ;;  %vm1674_vm12 = vcmask 851712   ;;  %vm1678_vm8 = vcmask 917312  }
 0x2e5   :  { %v1537_v7 = vmul.f32 %v3059_v1, %v1502_v33  ;;  %v1506_v60 = vsub.f32 1.0, %v1505_v37  ;;  %v1668_v37 = vadd.s32 4294967208, %v2631_v4  ;;  %vm1682_vm2 = vcmask 982912  }
 0x2e7   :  { %v1582_v8 = vsel %vm1539_vm15, %v1537_v7, 0.0  ;;  %v1507_v16 = vmul.f32 %v2324_v22, %v1506_v60 }
 0x2e8   :  { %1583 = vadd.xlane.f32.xlu2 %v1582_v8 }
 0x2e9   :  { %v1508_v44 = vadd.f32 %v2324_v22, %v1507_v16 }
 0x2eb   :  { %v1512_v31 = vsel %vm1511_vm1, %v2324_v22, %v1508_v44  ;;  %v1542_v51 = vpop.xlane.xlu2 %1541  ;;  %v1676_v44 = vadd.s32 4294967192, %v2631_v4  ;;  %vm1686_vm1 = vcmask 1048512  }
 0x2ec   :  { %v1517_v47 = vsel %vm1514_vm3, %v1516_v28, %v1512_v31  ;;  %v1595_v46 = vadd.f32 %v3146_v43, %v1542_v51 }
 0x2ed   :  { %v1538_v48 = vmul.f32 %v3059_v1, %v1517_v47  ;;  %v1628_v1 = vadd.s32 4294967288, %v2631_v4 }
 0x2ee   :  { %v1627_v36 = vperm.slane %v1595_v46, %v2631_v4 }
 0x2ef   :  { %v1585_v49 = vsel %vm1539_vm15, %v1538_v48, 0.0  ;;  %vm1630_vm15 = vcmask 130112   ;;  %v1680_v48 = vadd.s32 4294967184, %v2631_v4 }
 0x2f0   :  { %1586 = vadd.xlane.f32.xlu1 %v1585_v49 }
 0x2f3   :  { %v1545_v0 = vpop.xlane.xlu0 %1544 }
 0x2f4   :  { %v1596_v53 = vadd.f32 %v3146_v43, %v1545_v0 }
 0x2f6   :  { %v1629_v9 = vperm.slane %v1596_v53, %v1628_v1 }
 0x2f8   :  { %v1631_v50 = vsel %vm1630_vm15, %v1629_v9, %v1627_v36 }
 0x2fc   :  { %v1548_v52 = vpop.xlane.xlu1 %1547 }
 0x2fd   :  { %v1597_v29 = vadd.f32 %v3146_v43, %v1548_v52 }
 0x2ff   :  { %v1633_v38 = vperm.slane %v1597_v29, %v1632_v62 }
 0x301   :  { %v1635_v56 = vsel %vm1634_vm0, %v1633_v38, %v1631_v50 }
 0x303   :  { %v1551_v58 = vpop.xlane.xlu2 %1550 }
 0x304   :  { %v1598_v2 = vadd.f32 %v3146_v43, %v1551_v58 }
 0x306   :  { %v1637_v34 = vperm.slane %v1598_v2, %v1636_v54 }
 0x308   :  { %v1639_v14 = vsel %vm1638_vm5, %v1637_v34, %v1635_v56 }
 0x30b   :  { %v1554_v55 = vpop.xlane.xlu1 %1553 }
 0x30c   :  { %v1599_v32 = vadd.f32 %v3146_v43, %v1554_v55 }
 0x30e   :  { %v1641_v17 = vperm.slane %v1599_v32, %v1640_v59 }
 0x310   :  { %v1643_v10 = vsel %vm1642_vm4, %v1641_v17, %v1639_v14 }
 0x313   :  { %v1557_v27 = vpop.xlane.xlu2 %1556 }
 0x314   :  { %v1600_v11 = vadd.f32 %v3146_v43, %v1557_v27 }
 0x316   :  { %v1645_v42 = vperm.slane %v1600_v11, %v1644_v6 }
 0x318   :  { %v1647_v16 = vsel %vm1646_vm6, %v1645_v42, %v1643_v10 }
 0x31b   :  { %v1560_v26 = vpop.xlane.xlu1 %1559 }
 0x31c   :  { %v1601_v15 = vadd.f32 %v3146_v43, %v1560_v26 }
 0x31e   :  { %v1649_v45 = vperm.slane %v1601_v15, %v1648_v13 }
 0x320   :  { %v1651_v31 = vsel %vm1650_vm14, %v1649_v45, %v1647_v16 }
 0x323   :  { %v1563_v57 = vpop.xlane.xlu2 %1562 }
 0x324   :  { %v1602_v18 = vadd.f32 %v3146_v43, %v1563_v57 }
 0x326   :  { %v1653_v20 = vperm.slane %v1602_v18, %v1652_v25 }
 0x328   :  { %v1655_v51 = vsel %vm1654_vm9, %v1653_v20, %v1651_v31 }
 0x32b   :  { %v1566_v61 = vpop.xlane.xlu1 %1565 }
 0x32c   :  { %v1603_v24 = vadd.f32 %v3146_v43, %v1566_v61 }
 0x32e   :  { %v1657_v60 = vperm.slane %v1603_v24, %v1656_v41 }
 0x330   :  { %v1659_v58 = vsel %vm1658_vm7, %v1657_v60, %v1655_v51 }
 0x333   :  { %v1569_v35 = vpop.xlane.xlu0 %1568 }
 0x334   :  { %v1604_v23 = vadd.f32 %v3146_v43, %v1569_v35 }
 0x336   :  { %v1661_v21 = vperm.slane %v1604_v23, %v1660_v63 }
 0x338   :  { %v1663_v27 = vsel %vm1662_vm13, %v1661_v21, %v1659_v58 }
 0x33b   :  { %v1572_v30 = vpop.xlane.xlu2 %1571 }
 0x33c   :  { %v1605_v39 = vadd.f32 %v3146_v43, %v1572_v30 }
 0x33e   :  { %v1665_v47 = vperm.slane %v1605_v39, %v1664_v19 }
 0x340   :  { %v1667_v57 = vsel %vm1666_vm10, %v1665_v47, %v1663_v27 }
 0x343   :  { %v1575_v3 = vpop.xlane.xlu1 %1574 }
 0x344   :  { %v1606_v33 = vadd.f32 %v3146_v43, %v1575_v3 }
 0x346   :  { %v1669_v52 = vperm.slane %v1606_v33, %v1668_v37 }
 0x348   :  { %v1671_v30 = vsel %vm1670_vm11, %v1669_v52, %v1667_v57 }
 0x34b   :  { %v1578_v5 = vpop.xlane.xlu2 %1577 }
 0x34c   :  { %v1607_v8 = vadd.f32 %v3146_v43, %v1578_v5 }
 0x34e   :  { %v1673_v55 = vperm.slane %v1607_v8, %v1672_v40 }
 0x350   :  { %v1675_v53 = vsel %vm1674_vm12, %v1673_v55, %v1671_v30 }
 0x353   :  { %v1581_v22 = vpop.xlane.xlu1 %1580 }
 0x354   :  { %v1608_v28 = vadd.f32 %v3146_v43, %v1581_v22 }
 0x356   :  { %v1677_v26 = vperm.slane %v1608_v28, %v1676_v44 }
 0x358   :  { %v1679_v62 = vsel %vm1678_vm8, %v1677_v26, %v1675_v53 }
 0x35b   :  { %v1584_v7 = vpop.xlane.xlu2 %1583 }
 0x35c   :  { %v1609_v49 = vadd.f32 %v3146_v43, %v1584_v7 }
 0x35e   :  { %v1681_v61 = vperm.slane %v1609_v49, %v1680_v48 }
 0x360   :  { %v1683_v29 = vsel %vm1682_vm2, %v1681_v61, %v1679_v62 }
 0x363   :  { %v1587_v0 = vpop.xlane.xlu1 %1586 }
 0x364   :  { %v1610_v1 = vadd.f32 %v3146_v43, %v1587_v0 }
 0x366   :  { %v1685_v46 = vperm.slane %v1610_v1, %v1684_v12 }
 0x368   :  { %v1687_v4 = vsel %vm1686_vm1, %v1685_v46, %v1683_v29 }
 0x369   :  { %1689 = vst [vmem:[#allocation3] sm:$0x1] %v1687_v4 }
 0x36a   :  { %1928 = dma.vmem_to_hbm [thread:$0]  %s1924_s28, 16, %s1926_s12, [#allocation4]  }
 0x36b   :  { %2373 = dma.done.wait [#allocation4], 16  }
 0x36c   :  { %2374 = vsyncadd [#allocation4], 4294967280 }
 0x36d   :  { %2375 = dma.done.wait [#allocation6], 128  }
 0x36e   :  { %2376 = vsyncadd [#allocation6], 4294967168 }
 0x36f   :  { %1948 = vsyncpa [#allocation4], 1 }
 0x370   :  { %1949 = vsyncpa [#allocation6], 1 }

</bundles_post_ra>
